<compile_context>
chip_gen: v6e
topology: v6e:2x2x1
jax: 0.10.0
libtpu: 0.0.40
codegen_flags: <defaults>
</compile_context>

<pallas_src>
import math
import random

import numpy as np
import jax
import jax.numpy as jnp
from jax import lax
from jax.experimental import pallas as pl
from jax.experimental.pallas import tpu as pltpu


# ---------------------------------------------------------------------------
# Pallas kernel 1: per-position Mahalanobis distance (the PaDiM hot path)
#   dist[b, p] = diff^T icov diff = || L^T diff ||^2
#   with diff[b,i,p] = f[b,i,p] - mean[i,p] and icov[p] = L[p] L[p]^T.
#   L is stored packed: column j holds rows j..C-1 (length C-j), columns
#   concatenated, patch axis last (lanes), bf16.
# ---------------------------------------------------------------------------
def _mahalanobis_kernel(f_ref, mean_ref, l_ref, dist_ref):
    # f_ref: (B, C, TP) f32   mean_ref: (C, TP) f32
    # l_ref: (Cp_rows, TP) bf16 (packed lower-tri Cholesky, zero-padded rows)
    # dist_ref: (B, TP) f32
    B, C, TP = f_ref.shape
    diff = f_ref[...] - mean_ref[...][None, :, :]                  # (B, C, TP)
    dist = jnp.zeros((B, TP), jnp.float32)
    off = 0
    # Static unroll over the triangle columns: never materializes more than one
    # (B, C, TP)-sized temporary, and only one (C-j, TP) bf16 slice is upcast
    # at a time.  (For production C >= 128 this per-j contraction could be
    # moved onto the MXU; at tiny C the VPU form is cheaper.)
    for j in range(C):
        n = C - j
        lj = l_ref[pl.ds(off, n), :].astype(jnp.float32)           # (n, TP)
        zj = jnp.sum(lj[None, :, :] * diff[:, j:, :], axis=1)      # (B, TP)
        dist = dist + zj * zj
        off += n
    dist_ref[...] = dist


def _choose_tile_p(p_pad, b, c, cp_rows, vmem_budget, max_tile=512):
    """Largest lane tile (multiple of 128, <= max_tile) whose double-buffered
    working set fits the budget; prefer keeping >= 2 grid steps (v7x megacore)."""
    per_lane = 2 * (b * c * 4 + c * 4 + cp_rows * 2 + b * 4)   # double-buffered
    cands = [t for t in range(128, min(max_tile, p_pad) + 1, 128)
             if p_pad % t == 0 and t * per_lane <= vmem_budget]
    if not cands:
        return 128
    multi = [t for t in cands if p_pad // t >= 2]
    return max(multi) if multi else max(cands)


def mahalanobis_pallas(f_bcp, mean_cp, l_cp, *, vmem_budget=24 << 20):
    """f_bcp: (B, C, P) f32; mean_cp: (C, P_pad) f32; l_cp: (Cp_rows, P_pad) bf16.
    Returns dist (B, P) f32 (lane-dense output, patch axis on lanes)."""
    B, C, P = f_bcp.shape
    P_pad = mean_cp.shape[1]
    cp_rows = l_cp.shape[0]
    assert P_pad % 128 == 0 and P_pad >= P
    if P_pad != P:
        # Zero padding of f => diff = 0 in the pad region => dist = 0 there.
        f_bcp = jnp.pad(f_bcp, ((0, 0), (0, 0), (0, P_pad - P)))

    tile_p = _choose_tile_p(P_pad, B, C, cp_rows, vmem_budget)
    per_lane = 2 * (B * C * 4 + C * 4 + cp_rows * 2 + B * 4)
    vmem_limit = int(min(64 << 20, max(16 << 20, 2 * tile_p * per_lane)))

    cp = C * (C + 1) // 2
    flops = P_pad * B * (C + 2 * cp + 2 * C)
    bytes_accessed = (B * C * P_pad * 4 + C * P_pad * 4
                      + cp_rows * P_pad * 2 + B * P_pad * 4)

    dist_pad = pl.pallas_call(
        _mahalanobis_kernel,
        out_shape=jax.ShapeDtypeStruct((B, P_pad), jnp.float32),
        grid_spec=pltpu.PrefetchScalarGridSpec(
            num_scalar_prefetch=0,
            grid=(P_pad // tile_p,),
            in_specs=[
                pl.BlockSpec((B, C, tile_p), lambda i: (0, 0, i)),
                pl.BlockSpec((C, tile_p), lambda i: (0, i)),
                pl.BlockSpec((cp_rows, tile_p), lambda i: (0, i)),
            ],
            out_specs=pl.BlockSpec((B, tile_p), lambda i: (0, i)),
        ),
        compiler_params=pltpu.CompilerParams(
            dimension_semantics=("parallel",),
            vmem_limit_bytes=vmem_limit),
        cost_estimate=pl.CostEstimate(
            flops=flops, transcendentals=0, bytes_accessed=bytes_accessed),
    )(f_bcp, mean_cp, l_cp)
    return dist_pad[:, :P] if P_pad != P else dist_pad


# ---------------------------------------------------------------------------
# Pallas kernel 2: bilinear (align_corners=False) upsample of the score map,
# one launch for all batches:  out[b] = Ah @ S[b] @ Aw^T.
# W is contracted first in one flattened matmul so the intermediate and the
# per-batch output are lane-dense in Wo (no masked partial stores on W=16).
# ---------------------------------------------------------------------------
def _upsample_kernel(s_ref, ah_ref, awt_ref, o_ref):
    # s_ref: (B, H, W)  ah_ref: (Ho, H)  awt_ref: (W, Wo)  o_ref: (B, Ho, Wo)
    B, H, W = s_ref.shape
    x = jnp.dot(s_ref[...].reshape(B * H, W), awt_ref[...],
                preferred_element_type=jnp.float32)            # (B*H, Wo)
    x = x.reshape(B, H, -1)
    ah = ah_ref[...]
    for b in range(B):                                          # B small & static
        o_ref[b] = jnp.dot(ah, x[b], preferred_element_type=jnp.float32)


def bilinear_upsample_pallas(score, ah, aw_t):
    B, H, W = score.shape
    Ho, Wo = ah.shape[0], aw_t.shape[1]
    flops = 2 * B * (H * W * Wo + Ho * H * Wo)
    bytes_accessed = 4 * (score.size + ah.size + aw_t.size + B * Ho * Wo)
    return pl.pallas_call(
        _upsample_kernel,
        out_shape=jax.ShapeDtypeStruct((B, Ho, Wo), jnp.float32),
        cost_estimate=pl.CostEstimate(
            flops=flops, transcendentals=0, bytes_accessed=bytes_accessed),
    )(score, ah, aw_t)


# ---------------------------------------------------------------------------
# Host-side helpers (numpy, done once at setup — nothing scattered in the
# traced forward).
# ---------------------------------------------------------------------------
def bilinear_matrix(out_size, in_size):
    """PyTorch-equivalent bilinear interpolation matrix (align_corners=False)."""
    scale = in_size / out_size
    o = np.arange(out_size, dtype=np.float64)
    src = np.maximum((o + 0.5) * scale - 0.5, 0.0)
    x0 = np.clip(np.floor(src).astype(np.int64), 0, in_size - 1)
    x1 = np.clip(x0 + 1, 0, in_size - 1)
    w1 = src - x0
    w0 = 1.0 - w1
    m = np.zeros((out_size, in_size), np.float64)
    rows = np.arange(out_size)
    np.add.at(m, (rows, x0), w0)
    np.add.at(m, (rows, x1), w1)
    return jnp.asarray(m, dtype=jnp.float32)


def pack_padim_stats(mean_pc, icov_pcc):
    """Pack PaDiM Gaussian stats into the kernel layout (host-side, once).

    Returns:
      mean_cp : (C, P_pad) f32   — patch axis padded to a multiple of 128
      l_cp    : (Cp_rows, P_pad) bf16 — per-position lower-triangular Cholesky
                factor of icov, packed column-major (col j holds rows j..C-1),
                rows zero-padded to a multiple of 16 (bf16 sublane tile).
    """
    mean_pc = np.asarray(mean_pc, np.float32)
    icov_pcc = np.asarray(icov_pcc, np.float32)
    P, C = mean_pc.shape
    P_pad = ((P + 127) // 128) * 128
    L = np.linalg.cholesky(icov_pcc)                 # (P, C, C), lower triangular
    cols = [L[:, j:, j] for j in range(C)]           # col j: (P, C-j)
    l_pc = np.concatenate(cols, axis=1)              # (P, C*(C+1)/2)
    cp = l_pc.shape[1]
    cp_rows = ((cp + 15) // 16) * 16
    l_cp = np.zeros((cp_rows, P_pad), np.float32)
    l_cp[:cp, :P] = l_pc.T
    mean_cp = np.zeros((C, P_pad), np.float32)
    mean_cp[:, :P] = mean_pc.T
    return jnp.asarray(mean_cp), jnp.asarray(l_cp, dtype=jnp.bfloat16)


def unpack_quantized_icov(l_cp_bf16, C, P):
    """Reconstruct the f32 icov implied by the bf16 packed Cholesky factor
    (used by the pure-JAX reference so it consumes the same quantized stats)."""
    l = np.asarray(l_cp_bf16.astype(jnp.float32))[: C * (C + 1) // 2, :P]
    L = np.zeros((P, C, C), np.float32)
    off = 0
    for j in range(C):
        n = C - j
        L[:, j:, j] = l[off:off + n, :].T
        off += n
    return jnp.asarray(np.einsum("pij,pkj->pik", L, L))


# ---------------------------------------------------------------------------
# Glue: synthetic multi-scale feature extractor (plain JAX)
# ---------------------------------------------------------------------------
def conv2d(x, w, stride):
    return lax.conv_general_dilated(
        x, w, window_strides=(stride, stride), padding="SAME",
        dimension_numbers=("NCHW", "OIHW", "NCHW"))


def init_extractor_params(key):
    # TODO(synk): torchvision ResNet18 (weights=None) backbone has no clean small
    # Pallas equivalent; replaced by a scaled-down 4-conv synthetic backbone with
    # the same multi-scale hook/interpolate/concat structure (16/32/64 channels
    # instead of 64/128/256 for layer1/2/3).
    dims = [(8, 3, 3, 3), (16, 8, 3, 3), (32, 16, 3, 3), (64, 32, 3, 3)]
    keys = jax.random.split(key, len(dims))
    params = []
    for k, (o, i, kh, kw) in zip(keys, dims):
        std = math.sqrt(2.0 / (i * kh * kw))
        params.append(jax.random.normal(k, (o, i, kh, kw), jnp.float32) * std)
    return params


def extract_features(x, params, sel_per_layer, resize_mats):
    """Multi-scale features: select channels FIRST, bilinearly resize to the
    layer1 resolution with precomputed matrices, channel-concat -> (B,C,Ht,Wt)."""
    h = jax.nn.relu(conv2d(x, params[0], 2))       # stem
    f1 = jax.nn.relu(conv2d(h, params[1], 2))      # "layer1"
    f2 = jax.nn.relu(conv2d(f1, params[2], 2))     # "layer2"
    f3 = jax.nn.relu(conv2d(f2, params[3], 2))     # "layer3"
    parts = []
    for f, sel, mats in zip((f1, f2, f3), sel_per_layer, resize_mats):
        if sel.shape[0] == 0:
            continue
        fs = f[:, sel]                             # channel-select before resize
        if mats is None:
            parts.append(fs)
        else:
            ah, aw = mats
            parts.append(jnp.einsum("oh,bchw,Pw->bcoP", ah, fs, aw))
    return jnp.concatenate(parts, axis=1)          # (B, Csel, Ht, Wt)


# ---------------------------------------------------------------------------
# PaDiM forward
# ---------------------------------------------------------------------------
def padim_forward(x, params, sel_per_layer, resize_mats,
                  mean_cp, l_cp, up_ah, up_awt):
    emb = extract_features(x, params, sel_per_layer, resize_mats)   # (B,C,Ht,Wt)
    B, C, Ht, Wt = emb.shape
    f_bcp = emb.reshape(B, C, Ht * Wt)                  # patch axis last (lanes)
    dist_bp = mahalanobis_pallas(f_bcp, mean_cp, l_cp)  # (B, P)       [Pallas]
    score = dist_bp.reshape(B, Ht, Wt)
    return bilinear_upsample_pallas(score, up_ah, up_awt)  # (B,Ho,Wo) [Pallas]


def padim_forward_ref(x, params, sel_per_layer, resize_mats,
                      mean_pc, icov_pcc, up_ah, up_aw):
    """Pure-JAX reference matching the PyTorch forward semantics."""
    emb = extract_features(x, params, sel_per_layer, resize_mats)
    B, C, Ht, Wt = emb.shape
    f_bpc = jnp.transpose(emb.reshape(B, C, Ht * Wt), (0, 2, 1))
    diff = f_bpc - mean_pc[None]
    dist = jnp.einsum("bpi,pij,bpj->bp", diff, icov_pcc.astype(jnp.float32), diff)
    score = dist.reshape(B, Ht, Wt)
    return jnp.einsum("oh,bhw,Pw->boP", up_ah, score, up_aw)


if __name__ == "__main__":
    B, Cin, Himg, Wimg = 2, 3, 64, 64
    max_features = 16
    layer_dims = (16, 32, 64)          # synthetic layer1/2/3 channel counts
    orig_dims = sum(layer_dims)        # 112

    key = jax.random.PRNGKey(0)
    k_x, k_p, k_m, k_a = jax.random.split(key, 4)

    params = init_extractor_params(k_p)
    x = jax.random.normal(k_x, (B, Cin, Himg, Wimg), jnp.float32)

    # Channel selection (PyTorch: random.sample over the concatenated dims),
    # split per layer so selection happens before the resize.
    sel_idx = np.array(sorted(random.Random(0).sample(range(orig_dims),
                                                      max_features)),
                       dtype=np.int32)
    bounds = np.cumsum((0,) + layer_dims)
    sel_per_layer = tuple(sel_idx[(sel_idx >= lo) & (sel_idx < hi)] - lo
                          for lo, hi in zip(bounds[:-1], bounds[1:]))

    # Precomputed (host-side) bilinear resize / upsample matrices.
    Ht = Wt = Himg // 4                # layer1 resolution of the synthetic backbone
    feat_sizes = (Himg // 4, Himg // 8, Himg // 16)
    resize_mats = tuple(
        None if s == Ht else (bilinear_matrix(Ht, s), bilinear_matrix(Wt, s))
        for s in feat_sizes)
    up_ah = bilinear_matrix(Himg, Ht)
    up_aw = bilinear_matrix(Wimg, Wt)

    # Gaussian statistics normally produced by PaDiM.fit() — synthesized
    # deterministically, then packed ONCE into the kernel layout:
    # mean (C, P_pad) f32, packed lower-tri Cholesky of icov (Cp, P_pad) bf16.
    P, C = Ht * Wt, max_features
    mean_pc = jax.random.normal(k_m, (P, C), jnp.float32) * 0.1
    a = jax.random.normal(k_a, (P, C, C), jnp.float32) * 0.2
    icov_pcc = jnp.einsum("pij,pkj->pik", a, a) + 0.5 * jnp.eye(C, dtype=jnp.float32)[None]
    mean_cp, l_cp = pack_padim_stats(mean_pc, icov_pcc)
    # Reference consumes the same bf16-quantized stats the kernel uses.
    icov_hat = unpack_quantized_icov(l_cp, C, P)

    out = jax.block_until_ready(
        padim_forward(x, params, sel_per_layer, resize_mats,
                      mean_cp, l_cp, up_ah, up_aw.T))
    ref = padim_forward_ref(x, params, sel_per_layer, resize_mats,
                            mean_pc, icov_hat, up_ah, up_aw)

    assert out.shape == (B, Himg, Wimg)
    rel_err = float(jnp.max(jnp.abs(out - ref)) / (jnp.max(jnp.abs(ref)) + 1e-8))
    assert rel_err < 1e-2, f"mismatch vs reference: rel_err={rel_err}"
    print("KERNEL_OK")
</pallas_src>

<mosaic_0001>
module attributes {stable_mosaic.version = 11 : i64} {
  func.func @_mahalanobis_kernel(%arg0: i32, %arg1: memref<2x16x128xf32, #tpu.memory_space<vmem>>, %arg2: memref<16x128xf32, #tpu.memory_space<vmem>>, %arg3: memref<144x128xbf16, #tpu.memory_space<vmem>>, %arg4: memref<2x128xf32, #tpu.memory_space<vmem>>) attributes {dimension_semantics = [#tpu.dimension_semantics<parallel>], iteration_bounds = array<i64: 2>, scalar_prefetch = 0 : i64, scratch_operands = 0 : i64, tpu.core_type = #tpu.core_type<tc>, window_params = [{transform_indices = @transform_0, window_bounds = array<i64: 2, 16, 128>}, {transform_indices = @transform_1, window_bounds = array<i64: 16, 128>}, {transform_indices = @transform_2, window_bounds = array<i64: 144, 128>}, {transform_indices = @transform_3, window_bounds = array<i64: 2, 128>}]} {
    %c0 = arith.constant 0 : index
    %c0_0 = arith.constant 0 : index
    %c0_1 = arith.constant 0 : index
    %0 = vector.load %arg1[%c0, %c0_0, %c0_1] : memref<2x16x128xf32, #tpu.memory_space<vmem>>, vector<2x16x128xf32>
    %c0_2 = arith.constant 0 : index
    %c0_3 = arith.constant 0 : index
    %1 = vector.load %arg2[%c0_2, %c0_3] : memref<16x128xf32, #tpu.memory_space<vmem>>, vector<16x128xf32>
    %2 = vector.shape_cast %1 : vector<16x128xf32> to vector<1x16x128xf32>
    %3 = vector.broadcast %2 : vector<1x16x128xf32> to vector<2x16x128xf32>
    %4 = arith.subf %0, %3 : vector<2x16x128xf32>
    %cst = arith.constant 0.000000e+00 : f32
    %5 = vector.broadcast %cst : f32 to vector<2x128xf32>
    %c0_4 = arith.constant 0 : index
    %c0_5 = arith.constant 0 : index
    %6 = vector.load %arg3[%c0_4, %c0_5] : memref<144x128xbf16, #tpu.memory_space<vmem>>, vector<16x128xbf16>
    %7 = arith.extf %6 : vector<16x128xbf16> to vector<16x128xf32>
    %8 = vector.shape_cast %7 : vector<16x128xf32> to vector<1x16x128xf32>
    %9 = vector.broadcast %8 : vector<1x16x128xf32> to vector<2x16x128xf32>
    %10 = arith.mulf %9, %4 : vector<2x16x128xf32>
    %cst_6 = arith.constant dense<0.000000e+00> : vector<2x128xf32>
    %11 = vector.multi_reduction <add>, %10, %cst_6 [1] : vector<2x16x128xf32> to vector<2x128xf32>
    %12 = arith.mulf %11, %11 : vector<2x128xf32>
    %13 = arith.addf %5, %12 : vector<2x128xf32>
    %c16 = arith.constant 16 : index
    %c0_7 = arith.constant 0 : index
    %14 = vector.load %arg3[%c16, %c0_7] : memref<144x128xbf16, #tpu.memory_space<vmem>>, vector<15x128xbf16>
    %15 = arith.extf %14 : vector<15x128xbf16> to vector<15x128xf32>
    %16 = vector.shape_cast %15 : vector<15x128xf32> to vector<1x15x128xf32>
    %17 = vector.extract_strided_slice %4 {offsets = [0, 1, 0], sizes = [2, 15, 128], strides = [1, 1, 1]} : vector<2x16x128xf32> to vector<2x15x128xf32>
    %18 = vector.broadcast %16 : vector<1x15x128xf32> to vector<2x15x128xf32>
    %19 = arith.mulf %18, %17 : vector<2x15x128xf32>
    %cst_8 = arith.constant dense<0.000000e+00> : vector<2x128xf32>
    %20 = vector.multi_reduction <add>, %19, %cst_8 [1] : vector<2x15x128xf32> to vector<2x128xf32>
    %21 = arith.mulf %20, %20 : vector<2x128xf32>
    %22 = arith.addf %13, %21 : vector<2x128xf32>
    %c31 = arith.constant 31 : index
    %c0_9 = arith.constant 0 : index
    %23 = vector.load %arg3[%c31, %c0_9] : memref<144x128xbf16, #tpu.memory_space<vmem>>, vector<14x128xbf16>
    %24 = arith.extf %23 : vector<14x128xbf16> to vector<14x128xf32>
    %25 = vector.shape_cast %24 : vector<14x128xf32> to vector<1x14x128xf32>
    %26 = vector.extract_strided_slice %4 {offsets = [0, 2, 0], sizes = [2, 14, 128], strides = [1, 1, 1]} : vector<2x16x128xf32> to vector<2x14x128xf32>
    %27 = vector.broadcast %25 : vector<1x14x128xf32> to vector<2x14x128xf32>
    %28 = arith.mulf %27, %26 : vector<2x14x128xf32>
    %cst_10 = arith.constant dense<0.000000e+00> : vector<2x128xf32>
    %29 = vector.multi_reduction <add>, %28, %cst_10 [1] : vector<2x14x128xf32> to vector<2x128xf32>
    %30 = arith.mulf %29, %29 : vector<2x128xf32>
    %31 = arith.addf %22, %30 : vector<2x128xf32>
    %c45 = arith.constant 45 : index
    %c0_11 = arith.constant 0 : index
    %32 = vector.load %arg3[%c45, %c0_11] : memref<144x128xbf16, #tpu.memory_space<vmem>>, vector<13x128xbf16>
    %33 = arith.extf %32 : vector<13x128xbf16> to vector<13x128xf32>
    %34 = vector.shape_cast %33 : vector<13x128xf32> to vector<1x13x128xf32>
    %35 = vector.extract_strided_slice %4 {offsets = [0, 3, 0], sizes = [2, 13, 128], strides = [1, 1, 1]} : vector<2x16x128xf32> to vector<2x13x128xf32>
    %36 = vector.broadcast %34 : vector<1x13x128xf32> to vector<2x13x128xf32>
    %37 = arith.mulf %36, %35 : vector<2x13x128xf32>
    %cst_12 = arith.constant dense<0.000000e+00> : vector<2x128xf32>
    %38 = vector.multi_reduction <add>, %37, %cst_12 [1] : vector<2x13x128xf32> to vector<2x128xf32>
    %39 = arith.mulf %38, %38 : vector<2x128xf32>
    %40 = arith.addf %31, %39 : vector<2x128xf32>
    %c58 = arith.constant 58 : index
    %c0_13 = arith.constant 0 : index
    %41 = vector.load %arg3[%c58, %c0_13] : memref<144x128xbf16, #tpu.memory_space<vmem>>, vector<12x128xbf16>
    %42 = arith.extf %41 : vector<12x128xbf16> to vector<12x128xf32>
    %43 = vector.shape_cast %42 : vector<12x128xf32> to vector<1x12x128xf32>
    %44 = vector.extract_strided_slice %4 {offsets = [0, 4, 0], sizes = [2, 12, 128], strides = [1, 1, 1]} : vector<2x16x128xf32> to vector<2x12x128xf32>
    %45 = vector.broadcast %43 : vector<1x12x128xf32> to vector<2x12x128xf32>
    %46 = arith.mulf %45, %44 : vector<2x12x128xf32>
    %cst_14 = arith.constant dense<0.000000e+00> : vector<2x128xf32>
    %47 = vector.multi_reduction <add>, %46, %cst_14 [1] : vector<2x12x128xf32> to vector<2x128xf32>
    %48 = arith.mulf %47, %47 : vector<2x128xf32>
    %49 = arith.addf %40, %48 : vector<2x128xf32>
    %c70 = arith.constant 70 : index
    %c0_15 = arith.constant 0 : index
    %50 = vector.load %arg3[%c70, %c0_15] : memref<144x128xbf16, #tpu.memory_space<vmem>>, vector<11x128xbf16>
    %51 = arith.extf %50 : vector<11x128xbf16> to vector<11x128xf32>
    %52 = vector.shape_cast %51 : vector<11x128xf32> to vector<1x11x128xf32>
    %53 = vector.extract_strided_slice %4 {offsets = [0, 5, 0], sizes = [2, 11, 128], strides = [1, 1, 1]} : vector<2x16x128xf32> to vector<2x11x128xf32>
    %54 = vector.broadcast %52 : vector<1x11x128xf32> to vector<2x11x128xf32>
    %55 = arith.mulf %54, %53 : vector<2x11x128xf32>
    %cst_16 = arith.constant dense<0.000000e+00> : vector<2x128xf32>
    %56 = vector.multi_reduction <add>, %55, %cst_16 [1] : vector<2x11x128xf32> to vector<2x128xf32>
    %57 = arith.mulf %56, %56 : vector<2x128xf32>
    %58 = arith.addf %49, %57 : vector<2x128xf32>
    %c81 = arith.constant 81 : index
    %c0_17 = arith.constant 0 : index
    %59 = vector.load %arg3[%c81, %c0_17] : memref<144x128xbf16, #tpu.memory_space<vmem>>, vector<10x128xbf16>
    %60 = arith.extf %59 : vector<10x128xbf16> to vector<10x128xf32>
    %61 = vector.shape_cast %60 : vector<10x128xf32> to vector<1x10x128xf32>
    %62 = vector.extract_strided_slice %4 {offsets = [0, 6, 0], sizes = [2, 10, 128], strides = [1, 1, 1]} : vector<2x16x128xf32> to vector<2x10x128xf32>
    %63 = vector.broadcast %61 : vector<1x10x128xf32> to vector<2x10x128xf32>
    %64 = arith.mulf %63, %62 : vector<2x10x128xf32>
    %cst_18 = arith.constant dense<0.000000e+00> : vector<2x128xf32>
    %65 = vector.multi_reduction <add>, %64, %cst_18 [1] : vector<2x10x128xf32> to vector<2x128xf32>
    %66 = arith.mulf %65, %65 : vector<2x128xf32>
    %67 = arith.addf %58, %66 : vector<2x128xf32>
    %c91 = arith.constant 91 : index
    %c0_19 = arith.constant 0 : index
    %68 = vector.load %arg3[%c91, %c0_19] : memref<144x128xbf16, #tpu.memory_space<vmem>>, vector<9x128xbf16>
    %69 = arith.extf %68 : vector<9x128xbf16> to vector<9x128xf32>
    %70 = vector.shape_cast %69 : vector<9x128xf32> to vector<1x9x128xf32>
    %71 = vector.extract_strided_slice %4 {offsets = [0, 7, 0], sizes = [2, 9, 128], strides = [1, 1, 1]} : vector<2x16x128xf32> to vector<2x9x128xf32>
    %72 = vector.broadcast %70 : vector<1x9x128xf32> to vector<2x9x128xf32>
    %73 = arith.mulf %72, %71 : vector<2x9x128xf32>
    %cst_20 = arith.constant dense<0.000000e+00> : vector<2x128xf32>
    %74 = vector.multi_reduction <add>, %73, %cst_20 [1] : vector<2x9x128xf32> to vector<2x128xf32>
    %75 = arith.mulf %74, %74 : vector<2x128xf32>
    %76 = arith.addf %67, %75 : vector<2x128xf32>
    %c100 = arith.constant 100 : index
    %c0_21 = arith.constant 0 : index
    %77 = vector.load %arg3[%c100, %c0_21] : memref<144x128xbf16, #tpu.memory_space<vmem>>, vector<8x128xbf16>
    %78 = arith.extf %77 : vector<8x128xbf16> to vector<8x128xf32>
    %79 = vector.shape_cast %78 : vector<8x128xf32> to vector<1x8x128xf32>
    %80 = vector.extract_strided_slice %4 {offsets = [0, 8, 0], sizes = [2, 8, 128], strides = [1, 1, 1]} : vector<2x16x128xf32> to vector<2x8x128xf32>
    %81 = vector.broadcast %79 : vector<1x8x128xf32> to vector<2x8x128xf32>
    %82 = arith.mulf %81, %80 : vector<2x8x128xf32>
    %cst_22 = arith.constant dense<0.000000e+00> : vector<2x128xf32>
    %83 = vector.multi_reduction <add>, %82, %cst_22 [1] : vector<2x8x128xf32> to vector<2x128xf32>
    %84 = arith.mulf %83, %83 : vector<2x128xf32>
    %85 = arith.addf %76, %84 : vector<2x128xf32>
    %c108 = arith.constant 108 : index
    %c0_23 = arith.constant 0 : index
    %86 = vector.load %arg3[%c108, %c0_23] : memref<144x128xbf16, #tpu.memory_space<vmem>>, vector<7x128xbf16>
    %87 = arith.extf %86 : vector<7x128xbf16> to vector<7x128xf32>
    %88 = vector.shape_cast %87 : vector<7x128xf32> to vector<1x7x128xf32>
    %89 = vector.extract_strided_slice %4 {offsets = [0, 9, 0], sizes = [2, 7, 128], strides = [1, 1, 1]} : vector<2x16x128xf32> to vector<2x7x128xf32>
    %90 = vector.broadcast %88 : vector<1x7x128xf32> to vector<2x7x128xf32>
    %91 = arith.mulf %90, %89 : vector<2x7x128xf32>
    %cst_24 = arith.constant dense<0.000000e+00> : vector<2x128xf32>
    %92 = vector.multi_reduction <add>, %91, %cst_24 [1] : vector<2x7x128xf32> to vector<2x128xf32>
    %93 = arith.mulf %92, %92 : vector<2x128xf32>
    %94 = arith.addf %85, %93 : vector<2x128xf32>
    %c115 = arith.constant 115 : index
    %c0_25 = arith.constant 0 : index
    %95 = vector.load %arg3[%c115, %c0_25] : memref<144x128xbf16, #tpu.memory_space<vmem>>, vector<6x128xbf16>
    %96 = arith.extf %95 : vector<6x128xbf16> to vector<6x128xf32>
    %97 = vector.shape_cast %96 : vector<6x128xf32> to vector<1x6x128xf32>
    %98 = vector.extract_strided_slice %4 {offsets = [0, 10, 0], sizes = [2, 6, 128], strides = [1, 1, 1]} : vector<2x16x128xf32> to vector<2x6x128xf32>
    %99 = vector.broadcast %97 : vector<1x6x128xf32> to vector<2x6x128xf32>
    %100 = arith.mulf %99, %98 : vector<2x6x128xf32>
    %cst_26 = arith.constant dense<0.000000e+00> : vector<2x128xf32>
    %101 = vector.multi_reduction <add>, %100, %cst_26 [1] : vector<2x6x128xf32> to vector<2x128xf32>
    %102 = arith.mulf %101, %101 : vector<2x128xf32>
    %103 = arith.addf %94, %102 : vector<2x128xf32>
    %c121 = arith.constant 121 : index
    %c0_27 = arith.constant 0 : index
    %104 = vector.load %arg3[%c121, %c0_27] : memref<144x128xbf16, #tpu.memory_space<vmem>>, vector<5x128xbf16>
    %105 = arith.extf %104 : vector<5x128xbf16> to vector<5x128xf32>
    %106 = vector.shape_cast %105 : vector<5x128xf32> to vector<1x5x128xf32>
    %107 = vector.extract_strided_slice %4 {offsets = [0, 11, 0], sizes = [2, 5, 128], strides = [1, 1, 1]} : vector<2x16x128xf32> to vector<2x5x128xf32>
    %108 = vector.broadcast %106 : vector<1x5x128xf32> to vector<2x5x128xf32>
    %109 = arith.mulf %108, %107 : vector<2x5x128xf32>
    %cst_28 = arith.constant dense<0.000000e+00> : vector<2x128xf32>
    %110 = vector.multi_reduction <add>, %109, %cst_28 [1] : vector<2x5x128xf32> to vector<2x128xf32>
    %111 = arith.mulf %110, %110 : vector<2x128xf32>
    %112 = arith.addf %103, %111 : vector<2x128xf32>
    %c126 = arith.constant 126 : index
    %c0_29 = arith.constant 0 : index
    %113 = vector.load %arg3[%c126, %c0_29] : memref<144x128xbf16, #tpu.memory_space<vmem>>, vector<4x128xbf16>
    %114 = arith.extf %113 : vector<4x128xbf16> to vector<4x128xf32>
    %115 = vector.shape_cast %114 : vector<4x128xf32> to vector<1x4x128xf32>
    %116 = vector.extract_strided_slice %4 {offsets = [0, 12, 0], sizes = [2, 4, 128], strides = [1, 1, 1]} : vector<2x16x128xf32> to vector<2x4x128xf32>
    %117 = vector.broadcast %115 : vector<1x4x128xf32> to vector<2x4x128xf32>
    %118 = arith.mulf %117, %116 : vector<2x4x128xf32>
    %cst_30 = arith.constant dense<0.000000e+00> : vector<2x128xf32>
    %119 = vector.multi_reduction <add>, %118, %cst_30 [1] : vector<2x4x128xf32> to vector<2x128xf32>
    %120 = arith.mulf %119, %119 : vector<2x128xf32>
    %121 = arith.addf %112, %120 : vector<2x128xf32>
    %c130 = arith.constant 130 : index
    %c0_31 = arith.constant 0 : index
    %122 = vector.load %arg3[%c130, %c0_31] : memref<144x128xbf16, #tpu.memory_space<vmem>>, vector<3x128xbf16>
    %123 = arith.extf %122 : vector<3x128xbf16> to vector<3x128xf32>
    %124 = vector.shape_cast %123 : vector<3x128xf32> to vector<1x3x128xf32>
    %125 = vector.extract_strided_slice %4 {offsets = [0, 13, 0], sizes = [2, 3, 128], strides = [1, 1, 1]} : vector<2x16x128xf32> to vector<2x3x128xf32>
    %126 = vector.broadcast %124 : vector<1x3x128xf32> to vector<2x3x128xf32>
    %127 = arith.mulf %126, %125 : vector<2x3x128xf32>
    %cst_32 = arith.constant dense<0.000000e+00> : vector<2x128xf32>
    %128 = vector.multi_reduction <add>, %127, %cst_32 [1] : vector<2x3x128xf32> to vector<2x128xf32>
    %129 = arith.mulf %128, %128 : vector<2x128xf32>
    %130 = arith.addf %121, %129 : vector<2x128xf32>
    %c133 = arith.constant 133 : index
    %c0_33 = arith.constant 0 : index
    %131 = vector.load %arg3[%c133, %c0_33] : memref<144x128xbf16, #tpu.memory_space<vmem>>, vector<2x128xbf16>
    %132 = arith.extf %131 : vector<2x128xbf16> to vector<2x128xf32>
    %133 = vector.shape_cast %132 : vector<2x128xf32> to vector<1x2x128xf32>
    %134 = vector.extract_strided_slice %4 {offsets = [0, 14, 0], sizes = [2, 2, 128], strides = [1, 1, 1]} : vector<2x16x128xf32> to vector<2x2x128xf32>
    %135 = vector.broadcast %133 : vector<1x2x128xf32> to vector<2x2x128xf32>
    %136 = arith.mulf %135, %134 : vector<2x2x128xf32>
    %cst_34 = arith.constant dense<0.000000e+00> : vector<2x128xf32>
    %137 = vector.multi_reduction <add>, %136, %cst_34 [1] : vector<2x2x128xf32> to vector<2x128xf32>
    %138 = arith.mulf %137, %137 : vector<2x128xf32>
    %139 = arith.addf %130, %138 : vector<2x128xf32>
    %c135 = arith.constant 135 : index
    %c0_35 = arith.constant 0 : index
    %140 = vector.load %arg3[%c135, %c0_35] : memref<144x128xbf16, #tpu.memory_space<vmem>>, vector<1x128xbf16>
    %141 = arith.extf %140 : vector<1x128xbf16> to vector<1x128xf32>
    %142 = vector.shape_cast %141 : vector<1x128xf32> to vector<1x1x128xf32>
    %143 = vector.extract_strided_slice %4 {offsets = [0, 15, 0], sizes = [2, 1, 128], strides = [1, 1, 1]} : vector<2x16x128xf32> to vector<2x1x128xf32>
    %144 = vector.broadcast %142 : vector<1x1x128xf32> to vector<2x1x128xf32>
    %145 = arith.mulf %144, %143 : vector<2x1x128xf32>
    %cst_36 = arith.constant dense<0.000000e+00> : vector<2x128xf32>
    %146 = vector.multi_reduction <add>, %145, %cst_36 [1] : vector<2x1x128xf32> to vector<2x128xf32>
    %147 = arith.mulf %146, %146 : vector<2x128xf32>
    %148 = arith.addf %139, %147 : vector<2x128xf32>
    %c0_37 = arith.constant 0 : index
    %c0_38 = arith.constant 0 : index
    %149 = vector.load %arg4[%c0_37, %c0_38] : memref<2x128xf32, #tpu.memory_space<vmem>>, vector<2x128xf32>
    tpu.vector_store %arg4[%c0_37, %c0_38], %148 {strides = array<i32>} : memref<2x128xf32, #tpu.memory_space<vmem>>, vector<2x128xf32>,
    return
  }
  func.func @transform_0(%arg0: i32) -> (i32, i32, i32) {
    %c0_i32 = arith.constant 0 : i32
    %c0_i32_0 = arith.constant 0 : i32
    %c0_i32_1 = arith.constant 0 : i32
    return %c0_i32, %c0_i32_0, %arg0 : i32, i32, i32
  }
  func.func @transform_1(%arg0: i32) -> (i32, i32) {
    %c0_i32 = arith.constant 0 : i32
    %c0_i32_0 = arith.constant 0 : i32
    return %c0_i32, %arg0 : i32, i32
  }
  func.func @transform_2(%arg0: i32) -> (i32, i32) {
    %c0_i32 = arith.constant 0 : i32
    %c0_i32_0 = arith.constant 0 : i32
    return %c0_i32, %arg0 : i32, i32
  }
  func.func @transform_3(%arg0: i32) -> (i32, i32) {
    %c0_i32 = arith.constant 0 : i32
    %c0_i32_0 = arith.constant 0 : i32
    return %c0_i32, %arg0 : i32, i32
  }
}

</mosaic_0001>

<bundles_post_ra>
// kernel: tpu_custom_call.1
= control target key start
LH: loop header
LB: loop body
LE: loop exit
PB: predicated region body
PF: predicated region fallthrough
CT: control target
= control target key end

     0   :  { %s1800_s0 = inlined_call_operand.hbm [shape: f32[2,16,256], index: 0, kind: input, shape index: {}]   ;;  %s1801_s1 = inlined_call_operand.hbm [shape: f32[16,256], index: 1, kind: input, shape index: {}]   ;;  %s1802_s2 = inlined_call_operand.hbm [shape: bf16[144,256], index: 2, kind: input, shape index: {}]   ;;  %s1803_s3 = inlined_call_operand.hbm [shape: f32[2,256], index: 3, kind: output, shape index: {}]  }
   0x1   :  { %1810 = sst [smem:[#allocation12_spill]] %s1800_s0 }
   0x2   :  { %1811 = sst [smem:[#allocation13_spill]] %s1801_s1 }
   0x3   :  { %8 = vsyncpa [#allocation3], 0 }
   0x4   :  { %10 = vsyncpa [#allocation3 + $0x1], 0 }
   0x5   :  { %11 = vsyncpa [#allocation6], 0 }
   0x6   :  { %13 = vsyncpa [#allocation6 + $0x1], 0 }
   0x7   :  { %14 = vsyncpa [#allocation4], 0 }
   0x8   :  { %16 = vsyncpa [#allocation4 + $0x1], 0  ;;  %s1345_s12 = smov 0   ;;  %s1347_s13 = smov 0  }
   0x9   :  { %s1349_s14 = smov 0   ;;  %s1351_s15 = smov 0  }
   0xa LB: > { %s1366_s16 = sadd.s32 4294967295, %s1314_s15   ;;  %s1074_s17 = sadd.s32 4294967294, %s1314_s15   ;;  %s1314_s15 = sphi %s1351_s15, %s1833_s15   ;;  %s1310_s14 = sphi %s1349_s14, %s1832_s14   ;;  %s1306_s13 = sphi %s1347_s13, %s1831_s13   ;;  %s1302_s12 = sphi %s1345_s12, %s1830_s12  }
   0xb   : > { %s1370_s18 = sadd.s32 1, %s1314_s15   ;;  %s29_s19 = sadd.s32 1, %s1310_s14 }
   0xc   : > { %s26_s20 = ssub.s32 %s1314_s15, %s1370_s18  ;;  %p36_p0 = scmp.ne.s32.totalorder %s1310_s14, %s1306_s13 }
   0xd   : > { %p27_p1 = scmp.eq.s32.totalorder %s26_s20, 0  ;;  %p37_p2 = scmp.eq.s32.totalorder %s1314_s15, 0 }
   0xe   : > { %p42_p3 = scmp.ne.s32.totalorder %s1306_s13, %s1302_s12  ;;  %p43_p4 = scmp.eq.s32.totalorder %s1366_s16, 0 }
   0xf   : > { %s1382_s21 = scalar_select %p27_p1, %s1310_s14, %s29_s19  }
  0x10   : > { %p38_p5 = por %p37_p2, %p36_p0  ;;  %p1384_p6 = por %p43_p4, %p42_p3 }
  0x11   : > { %p118_p7 = scmp.eq.s32.totalorder %s1366_s16, 1  ;;  %p124_p8 = scmp.eq.s32.totalorder %s1074_s17, 1 }
  0x12   : > { %s1812_s22 = scalar_select %p1384_p6, 1, 0 }
  0x13   : > { %p1123_p10 = scmp.lt.s32.totalorder %s1314_s15, 2  ;;  %p1391_p11 = por %p118_p7, %p36_p0 }
  0x14   : > { %p1395_p12 = por %p124_p8, %p42_p3  ;;  %s1400_s25 = sand.u32 1, %s1310_s14  }
  0x15   : > { %s1813_s23 = scalar_select %p1391_p11, 1, 0 }
  0x16   : > { %s1814_s24 = scalar_select %p1395_p12, 1, 0 }
  0x17   : > { %s1078_s26 = sshll.u32 %s1314_s15, 7  ;;  %p1403_p13 = pnand %p1123_p10, %p38_p5 }
  0x18   : > { %s164_s28 = sand.u32 1, %s1314_s15   ;;  %s1079_s29 = sshll.u32 %s1400_s25, 4 }
  0x19   : > { %s1816_s1 = sld [smem:[#allocation13_spill]]  ;;  %s168_s6 = scalar_lea.vmem [#allocation5], %s1079_s29 }
  0x1a   : > { %s174_s7 = sshll.u32 %s168_s6, 4  ;;  %s1420_s8 = scalar_lea.sflag [#allocation6], %s164_s28  ;;  %s1417_s7 = int_to_ptr.vmem [resolvable:$true] %s174_s7 }
  0x1b   : > { %p1426_p3 = pneg %p1403_p13 }
  0x1f   : > { %s1414_s5 = scalar_lea.hbm %s1816_s1, %s1078_s26  ;;  %s1167_s19 = scalar_lea.hbm %s1816_s1, 512 }
  0x20   : > { %s1162_s9 = scalar_lea.hbm %s1414_s5, 256  ;;  %p1168_p7 = scmp.lt.s32.totalorder %s1414_s5, %s1816_s1 }
  0x21   : > { %p1163_p2 = scmp.ne.s32.totalorder %s1414_s5, %s1162_s9  ;;  %p1169_p8 = scmp.lt.s32.totalorder %s1167_s19, %s1162_s9 }
  0x23   : > { %p1165_p4 = pnand %p1426_p3, %p1163_p2  ;;  %p1170_p10 = por %p1169_p8, %p1168_p7 }
  0x25   : > { %p1166_p5 = pneg %p1165_p4 }
  0x27   : > { %p1171_p9 = pnand %p1170_p10, %p1166_p5 }
  0x29   : > { %1174 = shalt.err (!%p1171_p9)
}
  0x2a   : > { %s1175_s28 = scalar_lea.vmem %s1417_s7, 256  ;;  %s1316_s30 = smov [#allocation5]  }
  0x2b   : > { %p1176_p0 = scmp.ne.s32.totalorder %s1417_s7, %s1175_s28  ;;  %s1180_s4 = sshll.u32 %s1316_s30, 4  ;;  %s1181_s4 = int_to_ptr.vmem [resolvable:$false] %s1180_s4 }
  0x2c   : > { %s1182_s6 = scalar_lea.vmem %s1181_s4, 512  ;;  %p1183_p1 = scmp.lt.s32.totalorder %s1417_s7, %s1181_s4 }
  0x2d   : > { %p1178_p2 = pnand %p1176_p0, %p1426_p3  ;;  %p1184_p12 = scmp.lt.s32.totalorder %s1182_s6, %s1175_s28 }
  0x2f   : > { %p1179_p4 = pneg %p1178_p2  ;;  %p1185_p11 = por %p1184_p12, %p1183_p1 }
  0x31   : > { %p1186_p6 = pnand %p1185_p11, %p1179_p4 }
  0x33   : > { %1189 = shalt.err (!%p1186_p6)
}
  0x34   : > { %s1806_s9 = smov 256   ;;  %s1807_s11 = smov 128  }
  0x35   : > { %s1809_s17 = smov 8   ;;  %p1818_p6 = scmp.lt.s32.totalorder %s1314_s15, 3 }
  0x36   : > { %1115 = dma.hbm_to_vmem [thread:$0]  (!%p1403_p13), %s1414_s5, 256, %s1417_s7, %s1420_s8, %s1806_s9, %s1807_s11, %s1809_s17  }
  0x37   : > { %p1819_p9 = scmp.ge.s32.totalorder %s1314_s15, 1  ;;  %s1077_s20 = sshll.u32 %s1400_s25, 5 }
  0x38   : > { %s1821_s0 = sld [smem:[#allocation12_spill]]  ;;  %s1099_s4 = smul.u32 72, %s1400_s25 }
  0x39   : > { %p1456_p11 = pnand %p1819_p9, %p1818_p6  ;;  %s148_s6 = scalar_lea.vmem [#allocation2], %s1077_s20 }
  0x3a   : > { %s154_s1 = sshll.u32 %s148_s6, 4  ;;  %s1081_s5 = sshll.u32 %s1314_s15, 6  ;;  %s1470_s1 = int_to_ptr.vmem [resolvable:$true] %s154_s1 }
  0x3b   : > { %s1820_s19 = scalar_select %p1456_p11, 1, 0 }
  0x3c   : > { %s145_s7 = scalar_lea.sflag [#allocation3], %s1400_s25 }
  0x3e   : > { %s1466_s30 = scalar_lea.hbm %s1821_s0, %s1078_s26  ;;  %s1195_s26 = scalar_lea.hbm %s1821_s0, 1024 }
  0x3f   : > { %s1190_s9 = scalar_lea.hbm %s1466_s30, 512  ;;  %p1196_p5 = scmp.lt.s32.totalorder %s1466_s30, %s1821_s0 }
  0x40   : > { %p1191_p12 = scmp.ne.s32.totalorder %s1466_s30, %s1190_s9  ;;  %p1197_p7 = scmp.lt.s32.totalorder %s1195_s26, %s1190_s9 }
  0x42   : > { %p1193_p0 = pnand %p1191_p12, %p1426_p3  ;;  %p1198_p8 = por %p1197_p7, %p1196_p5 }
  0x44   : > { %p1194_p1 = pneg %p1193_p0 }
  0x46   : > { %p1199_p10 = pnand %p1198_p8, %p1194_p1 }
  0x48   : > { %1202 = shalt.err (!%p1199_p10)
}
  0x49   : > { %s1203_s20 = scalar_lea.vmem %s1470_s1, 512  ;;  %s1320_s6 = smov [#allocation2]  }
  0x4a   : > { %p1204_p2 = scmp.ne.s32.totalorder %s1470_s1, %s1203_s20  ;;  %s1208_s11 = sshll.u32 %s1320_s6, 4  ;;  %s1209_s11 = int_to_ptr.vmem [resolvable:$false] %s1208_s11 }
  0x4b   : > { %s1210_s17 = scalar_lea.vmem %s1209_s11, 1024  ;;  %p1211_p9 = scmp.lt.s32.totalorder %s1470_s1, %s1209_s11 }
  0x4c   : > { %p1206_p4 = pnand %p1204_p2, %p1426_p3  ;;  %p1212_p12 = scmp.lt.s32.totalorder %s1210_s17, %s1203_s20 }
  0x4e   : > { %p1207_p6 = pneg %p1206_p4  ;;  %p1213_p0 = por %p1212_p12, %p1211_p9 }
  0x50   : > { %p1214_p11 = pnand %p1213_p0, %p1207_p6 }
  0x52   : > { %1217 = shalt.err (!%p1214_p11)
}
  0x53   : > { %s1822_s9 = smov 8   ;;  %s1823_s26 = smov 128  }
  0x54   : > { %s1824_s29 = smov 256   ;;  %s1501_s11 = scalar_lea.hbm %s1802_s2, %s1081_s5 }
  0x55   : > { %1112 = dma.hbm_to_vmem [thread:$0]  (!%p1403_p13), %s1466_s30, 512, %s1470_s1, %s145_s7, %s1824_s29, %s1823_s26, %s1822_s9  }
  0x56   : > { %s188_s20 = scalar_lea.vmem [#allocation7], %s1099_s4  ;;  %s1218_s0 = scalar_lea.hbm %s1501_s11, 1152 }
  0x57   : > { %s194_s17 = sshll.u32 %s188_s20, 4  ;;  %p1219_p11 = scmp.ne.s32.totalorder %s1501_s11, %s1218_s0  ;;  %s1505_s17 = int_to_ptr.vmem [resolvable:$true] %s194_s17 }
  0x58   : > { %s1223_s7 = scalar_lea.hbm %s1802_s2, 2304  ;;  %p1224_p7 = scmp.lt.s32.totalorder %s1501_s11, %s1802_s2 }
  0x59   : > { %p1221_p1 = pnand %p1219_p11, %p1426_p3  ;;  %p1225_p8 = scmp.lt.s32.totalorder %s1223_s7, %s1218_s0 }
  0x5b   : > { %p1222_p5 = pneg %p1221_p1  ;;  %p1226_p10 = por %p1225_p8, %p1224_p7 }
  0x5d   : > { %p1227_p2 = pnand %p1226_p10, %p1222_p5 }
  0x5f   : > { %1230 = shalt.err (!%p1227_p2)
}
  0x60   : > { %s1231_s25 = scalar_lea.vmem %s1505_s17, 1152  ;;  %s1321_s4 = smov [#allocation7]  }
  0x61   : > { %p1232_p4 = scmp.ne.s32.totalorder %s1505_s17, %s1231_s25  ;;  %s1236_s29 = sshll.u32 %s1321_s4, 4  ;;  %s1237_s29 = int_to_ptr.vmem [resolvable:$false] %s1236_s29 }
  0x62   : > { %s1238_s28 = scalar_lea.vmem %s1237_s29, 2304  ;;  %p1239_p12 = scmp.lt.s32.totalorder %s1505_s17, %s1237_s29 }
  0x63   : > { %p1234_p6 = pnand %p1232_p4, %p1426_p3  ;;  %p1240_p0 = scmp.lt.s32.totalorder %s1238_s28, %s1231_s25 }
  0x65   : > { %p1235_p9 = pneg %p1234_p6  ;;  %p1241_p11 = por %p1240_p0, %p1239_p12 }
  0x67   : > { %p1242_p1 = pnand %p1241_p11, %p1235_p9 }
  0x69   : > { %1245 = shalt.err (!%p1242_p1)
}
  0x6a   : > { %s1322_s0 = smov 64   ;;  %s1323_s6 = smov 4  }
  0x6b   : > { %1118 = dma.hbm_to_vmem [thread:$0]  (!%p1403_p13), %s1501_s11, 1152, %s1505_s17, %s1420_s8, %s1823_s26, %s1322_s0, %s1323_s6  }
  0x6c   : > { %p1825_p3 = scmp.ne.s32.totalorder %s1820_s19, 0 }
  0x6d   : > { %s1532_s10 = sand.u32 (!%p1825_p3), 1, %s1306_s13   ;;  %p1826_p5 = scmp.ne.s32.totalorder (!%p1825_p3), %s1812_s22, 0 }
  0x6e   : > { %206 = sbr.rel (%p1825_p3) target bundleno = 272 (0x110), region = 32  ;;  %s1083_s20 = sshll.u32 (!%p1825_p3), %s1532_s10, 5 }
  0x6f   : > { %s209_s1 = scalar_lea.sflag (!%p1825_p3), [#allocation3], %s1532_s10  ;;  %s212_s30 = scalar_lea.vmem (!%p1825_p3), [#allocation2], %s1083_s20 }
  0x73   : > { %1289 = dma.done.wait (%p1826_p5), %s209_s1, 512  }
  0x74   : > { %1291 = vsyncadd (%p1826_p5), %s209_s1, 4294966784  ;;  %s217_s27 = sand.u32 1, %s1366_s16   ;;  %s1084_s8 = sshll.u32 %s1532_s10, 4 }
  0x75   : > { %s218_s19 = scalar_lea.sflag [#allocation6], %s217_s27  ;;  %s221_s26 = scalar_lea.vmem [#allocation5], %s1084_s8 }
  0x76   : > { %1293 = dma.done.wait (%p1826_p5), %s218_s19, 1408  }
  0x77   : > { %1295 = vsyncadd (%p1826_p5), %s218_s19, 4294965888  ;;  %s1100_s11 = smul.u32 72, %s1532_s10  ;;  %v263_v0 = vld [vmem:[%s212_s30] sm:$0xff]  ;;  %v264_v1 = vld [vmem:[%s212_s30 + $0x8] sm:$0xff]  ;;  %vm307_vm0 = vcmask 1046528   ;;  %vm348_vm1 = vcmask 1044480  }
  0x78   : > { %v265_v2 = vld [vmem:[%s212_s30 + $0x10] sm:$0xff]  ;;  %v266_v3 = vld [vmem:[%s212_s30 + $0x18] sm:$0xff]  ;;  %vm373_vm2 = vcmask 1040384   ;;  %vm388_vm3 = vcmask 1045504   ;;  %vm415_vm4 = vcmask 1041408   ;;  %vm440_vm5 = vcmask 1042432  }
  0x79   : > { %v267_v4 = vld [vmem:[%s221_s26] sm:$0xff]  ;;  %v268_v5 = vld [vmem:[%s221_s26 + $0x8] sm:$0xff]  ;;  %s1555_s17 = scalar_lea.vmem [#allocation7], %s1100_s11  ;;  %vm507_vm6 = vcmask 1043456   ;;  %s1085_s22 = sshll.u32 %s1532_s10, 1 }
  0x7a   : > { %v1547_v6 = vsub.f32 %v263_v0, %v267_v4  ;;  %v1549_v7 = vsub.f32 %v264_v1, %v268_v5  ;;  %v1551_v8 = vsub.f32 %v265_v2, %v267_v4  ;;  %v1553_v9 = vsub.f32 %v266_v3, %v268_v5  ;;  %v1091_v10 = vld [vmem:[%s1555_s17] sm:$0xff]   ;;  %v1098_v11 = vld [vmem:[%s1555_s17 + $0x8] sm:$0xff]   ;;  %v1573_v25 = vld [vmem:[%s1555_s17 + $0x10] ss:$8 sps:$4 sm:$0xff]   ;;  %s1087_s7 = sshll.u32 %s1366_s16, 5  ;;  %s262_s9 = scalar_lea.vmem [#allocation8], %s1085_s22 }
  0x7b   : > { %v1092_v12 = vunpack.c.l.bf16 %v1091_v10  ;;  %v1093_v13 = vunpack.c.h.bf16 %v1091_v10  ;;  %v1096_v14 = vunpack.c.l.bf16 %v1098_v11  ;;  %v1097_v15 = vunpack.c.h.bf16 %v1098_v11  ;;  %v342_v24 = vld [vmem:[%s1555_s17 + $0xc] sm:$0x8]  ;;  %v344_v34 = vld [vmem:[%s1555_s17 + $0x14] sm:$0x7]  ;;  %s961_s5 = sshll.u32 %s262_s9, 4  ;;  %s959_s29 = scalar_lea.hbm %s1803_s3, %s1087_s7  ;;  %s962_s5 = int_to_ptr.vmem [resolvable:$true] %s961_s5 }
  0x7c   : > { %v308_v16 = vrot.slane %v1547_v6, 1  ;;  %v1561_v17 = vrot.slane %v1549_v7, 1  ;;  %v311_v18 = vrot.slane %v1551_v8, 1  ;;  %v1565_v19 = vrot.slane %v1553_v9, 1  ;;  %s948_s28 = scalar_lea.sflag [#allocation4], %s1532_s10  ;;  %s1246_s0 = scalar_lea.vmem %s962_s5, 32 }
  0x7d   : > { %v277_v20 = vmul.f32 %v1092_v12, %v1547_v6  ;;  %v278_v21 = vmul.f32 %v1093_v13, %v1549_v7  ;;  %v279_v22 = vmul.f32 %v1092_v12, %v1551_v8  ;;  %v280_v23 = vmul.f32 %v1093_v13, %v1553_v9  ;;  %p1247_p13 = scmp.ne.s32.totalorder %s962_s5, %s1246_s0  ;;  %p1827_p7 = scmp.ne.s32.totalorder %s1813_s23, 0 }
  0x7e   : > { %v310_v26 = vsel %vm307_vm0, %v308_v16, %v1561_v17  ;;  %v313_v27 = vsel %vm307_vm0, %v311_v18, %v1565_v19  ;;  %v319_v28 = vmul.f32 %v1097_v15, %v1561_v17  ;;  %v321_v29 = vmul.f32 %v1097_v15, %v1565_v19  ;;  %s1324_s6 = smov [#allocation8]  }
  0x7f   : > { %v281_v30 = vadd.f32 %v278_v21, %v277_v20  ;;  %v288_v31 = vadd.f32 %v280_v23, %v279_v22  ;;  %v318_v32 = vmul.f32 %v1096_v14, %v310_v26  ;;  %v320_v33 = vmul.f32 %v1096_v14, %v313_v27  ;;  %v409_v21 = vld [vmem:[%s1555_s17 + $0x14] sm:$0xc]  ;;  %p1248_p8 = pnand %p1247_p13, %p1827_p7  ;;  %s1250_s16 = sshll.u32 %s1324_s6, 4  ;;  %s1251_s16 = int_to_ptr.vmem [resolvable:$false] %s1250_s16 }
  0x80   : > { %v322_v35 = vsel %vm307_vm0, %v319_v28, 0.0  ;;  %v330_v36 = vsel %vm307_vm0, %v321_v29, 0.0  ;;  %v345_v37 = vunpack.c.l.bf16 %v342_v24  ;;  %v346_v38 = vunpack.c.l.bf16 %v1573_v25  ;;  %s1252_s20 = scalar_lea.vmem %s1251_s16, 64  ;;  %p1253_p2 = scmp.lt.s32.totalorder %s962_s5, %s1251_s16 }
  0x81   : > { %v282_v39 = vrot.slane %v281_v30, 4  ;;  %v289_v40 = vrot.slane %v288_v31, 4  ;;  %v323_v41 = vadd.f32 %v322_v35, %v318_v32  ;;  %v331_v42 = vadd.f32 %v330_v36, %v320_v33  ;;  %p1249_p10 = pneg %p1248_p8  ;;  %p1254_p4 = scmp.lt.s32.totalorder %s1252_s20, %s1246_s0 }
  0x82   : > { %v347_v43 = vunpack.c.l.bf16 %v344_v34  ;;  %v349_v44 = vrot.slane %v1547_v6, 3  ;;  %v1587_v45 = vrot.slane %v1549_v7, 3  ;;  %v352_v46 = vrot.slane %v1551_v8, 3 }
  0x83   : > { %v283_v47 = vadd.f32 %v282_v39, %v281_v30  ;;  %v290_v48 = vadd.f32 %v289_v40, %v288_v31  ;;  %v324_v49 = vrot.slane %v323_v41, 4  ;;  %v332_v50 = vrot.slane %v331_v42, 4  ;;  %v411_v30 = vld [vmem:[%s1555_s17 + $0x1c] sm:$0x1]  ;;  %p1255_p6 = por %p1254_p4, %p1253_p2 }
  0x84   : > { %v351_v51 = vsel %vm348_vm1, %v349_v44, %v1587_v45  ;;  %v1593_v52 = vrot.slane %v1553_v9, 3  ;;  %v361_v53 = vmul.f32 %v349_v44, %v345_v37  ;;  %v363_v54 = vmul.f32 %v1587_v45, %v347_v43 }
  0x85   : > { %v284_v55 = vrot.slane %v283_v47, 2  ;;  %v291_v56 = vrot.slane %v290_v48, 2  ;;  %v325_v57 = vadd.f32 %v324_v49, %v323_v41  ;;  %v333_v58 = vadd.f32 %v332_v50, %v331_v42  ;;  %p1256_p9 = pnand %p1255_p6, %p1249_p10 }
  0x86   : > { %v354_v59 = vsel %vm348_vm1, %v352_v46, %v1593_v52  ;;  %v362_v60 = vmul.f32 %v351_v51, %v346_v38  ;;  %v364_v61 = vmul.f32 %v352_v46, %v345_v37  ;;  %v366_v62 = vmul.f32 %v1593_v52, %v347_v43 }
  0x87   : > { %v285_v63 = vadd.f32 %v284_v55, %v283_v47  ;;  %v292_v0 = vadd.f32 %v291_v56, %v290_v48  ;;  %v326_v1 = vrot.slane %v325_v57, 2  ;;  %v334_v2 = vrot.slane %v333_v58, 2 }
  0x88   : > { %v365_v3 = vmul.f32 %v354_v59, %v346_v38  ;;  %v374_v4 = vrot.slane %v361_v53, 7  ;;  %v375_v5 = vrot.slane %v362_v60, 7  ;;  %v377_v10 = vrot.slane %v363_v54, 7 }
  0x89   : > { %v286_v11 = vrot.slane %v285_v63, 1  ;;  %v293_v12 = vrot.slane %v292_v0, 1  ;;  %v327_v13 = vadd.f32 %v326_v1, %v325_v57  ;;  %v335_v14 = vadd.f32 %v334_v2, %v333_v58 }
  0x8a   : > { %v376_v15 = vsel %vm373_vm2, %v374_v4, %v375_v5  ;;  %v378_v16 = vsel %vm373_vm2, %v375_v5, %v377_v10  ;;  %v379_v18 = vrot.slane %v364_v61, 7  ;;  %v380_v20 = vrot.slane %v365_v3, 7 }
  0x8b   : > { %v287_v22 = vadd.f32 %v286_v11, %v285_v63  ;;  %v294_v23 = vadd.f32 %v293_v12, %v292_v0  ;;  %v328_v24 = vrot.slane %v327_v13, 1  ;;  %v336_v26 = vrot.slane %v335_v14, 1  ;;  %v476_v0 = vld [vmem:[%s1555_s17 + $0x20] sm:$0x7] }
  0x8c   : > { %v381_v27 = vsel %vm373_vm2, %v379_v18, %v380_v20  ;;  %v382_v28 = vrot.slane %v366_v62, 7  ;;  %v389_v29 = vsel %vm388_vm3, %v378_v16, 0.0  ;;  %v412_v34 = vunpack.c.l.bf16 %v409_v21 }
  0x8d   : > { %v295_v31 = vmul.f32 %v287_v22, %v287_v22  ;;  %v329_v32 = vadd.f32 %v328_v24, %v327_v13  ;;  %v337_v33 = vadd.f32 %v336_v26, %v335_v14  ;;  %v296_v35 = vmul.f32 %v294_v23, %v294_v23  ;;  %v475_v23 = vld [vmem:[%s1555_s17 + $0x1c] sm:$0xe] }
  0x8e   : > { %v383_v36 = vsel %vm373_vm2, %v380_v20, %v382_v28  ;;  %v390_v37 = vadd.f32 %v389_v29, %v376_v15  ;;  %v413_v38 = vunpack.c.h.bf16 %v1573_v25  ;;  %v414_v41 = vunpack.c.l.bf16 %v411_v30 }
  0x8f   : > { %v338_v39 = vmul.f32 %v329_v32, %v329_v32  ;;  %v397_v40 = vsel %vm388_vm3, %v383_v36, 0.0  ;;  %v416_v42 = vrot.slane %v1547_v6, 6  ;;  %v1610_v46 = vrot.slane %v1549_v7, 6 }
  0x90   : > { %v391_v43 = vrot.slane %v390_v37, 4  ;;  %v398_v44 = vadd.f32 %v397_v40, %v381_v27  ;;  %v419_v47 = vrot.slane %v1551_v8, 6  ;;  %v339_v48 = vmul.f32 %v337_v33, %v337_v33 }
  0x91   : > { %v1613_v49 = vadd.f32 %v338_v39, %v295_v31  ;;  %v1616_v50 = vrot.slane %v1553_v9, 6  ;;  %v428_v25 = vmul.f32 %v416_v42, %v412_v34  ;;  %v418_v54 = vsel %vm415_vm4, %v416_v42, %v1610_v46 }
  0x92   : > { %v392_v51 = vadd.f32 %v391_v43, %v390_v37  ;;  %v399_v53 = vrot.slane %v398_v44, 4  ;;  %v430_v55 = vmul.f32 %v1610_v46, %v414_v41  ;;  %v429_v57 = vmul.f32 %v418_v54, %v413_v38  ;;  %v528_v37 = vld [vmem:[%s1555_s17 + $0x20] sm:$0x8]  ;;  %v530_v54 = vld [vmem:[%s1555_s17 + $0x28] sm:$0x1] }
  0x93   : > { %v421_v56 = vsel %vm415_vm4, %v419_v47, %v1616_v50  ;;  %v431_v58 = vmul.f32 %v419_v47, %v412_v34  ;;  %v433_v59 = vmul.f32 %v1616_v50, %v414_v41  ;;  %v441_v63 = vrot.slane %v428_v25, 5 }
  0x94   : > { %v393_v60 = vrot.slane %v392_v51, 2  ;;  %v400_v61 = vadd.f32 %v399_v53, %v398_v44  ;;  %v432_v62 = vmul.f32 %v421_v56, %v413_v38  ;;  %v442_v1 = vrot.slane %v429_v57, 5 }
  0x95   : > { %v444_v2 = vrot.slane %v430_v55, 5  ;;  %v446_v3 = vrot.slane %v431_v58, 5  ;;  %v449_v4 = vrot.slane %v433_v59, 5  ;;  %v1625_v5 = vadd.f32 %v339_v48, %v296_v35  ;;  %v1650_v48 = vld [vmem:[%s1555_s17 + $0x24] sm:$0xff]  }
  0x96   : > { %v394_v10 = vadd.f32 %v393_v60, %v392_v51  ;;  %v401_v11 = vrot.slane %v400_v61, 2  ;;  %v447_v12 = vrot.slane %v432_v62, 5  ;;  %v443_v13 = vsel %vm440_vm5, %v441_v63, %v442_v1 }
  0x97   : > { %v445_v14 = vsel %vm440_vm5, %v442_v1, %v444_v2  ;;  %v478_v15 = vunpack.c.l.bf16 %v476_v0  ;;  %v479_v16 = vrot.slane %v1547_v6, 2  ;;  %v1636_v27 = vrot.slane %v1549_v7, 2 }
  0x98   : > { %v395_v18 = vrot.slane %v394_v10, 1  ;;  %v402_v20 = vadd.f32 %v401_v11, %v400_v61  ;;  %v448_v21 = vsel %vm440_vm5, %v446_v3, %v447_v12  ;;  %v450_v22 = vsel %vm440_vm5, %v447_v12, %v449_v4 }
  0x99   : > { %v455_v24 = vsel %vm348_vm1, %v445_v14, 0.0  ;;  %v463_v26 = vsel %vm348_vm1, %v450_v22, 0.0  ;;  %v482_v28 = vrot.slane %v1551_v8, 2  ;;  %v477_v33 = vunpack.c.l.bf16 %v475_v23 }
  0x9a   : > { %v396_v29 = vadd.f32 %v395_v18, %v394_v10  ;;  %v403_v30 = vrot.slane %v402_v20, 1  ;;  %v456_v31 = vadd.f32 %v455_v24, %v443_v13  ;;  %v464_v32 = vadd.f32 %v463_v26, %v448_v21 }
  0x9b   : > { %v481_v34 = vsel %vm388_vm3, %v479_v16, %v1636_v27  ;;  %v1642_v35 = vrot.slane %v1553_v9, 2  ;;  %v490_v36 = vmul.f32 %v1636_v27, %v478_v15  ;;  %v531_v55 = vunpack.c.l.bf16 %v528_v37 }
  0x9c   : > { %v404_v38 = vadd.f32 %v403_v30, %v402_v20  ;;  %v405_v39 = vmul.f32 %v396_v29, %v396_v29  ;;  %v457_v40 = vrot.slane %v456_v31, 4  ;;  %v465_v41 = vrot.slane %v464_v32, 4 }
  0x9d   : > { %v484_v42 = vsel %vm388_vm3, %v482_v28, %v1642_v35  ;;  %v489_v43 = vmul.f32 %v481_v34, %v477_v33  ;;  %v492_v44 = vmul.f32 %v1642_v35, %v478_v15  ;;  %v498_v47 = vrot.slane %v490_v36, 2 }
  0x9e   : > { %v406_v25 = vmul.f32 %v404_v38, %v404_v38  ;;  %v458_v51 = vadd.f32 %v457_v40, %v456_v31  ;;  %v466_v53 = vadd.f32 %v465_v41, %v464_v32  ;;  %v491_v56 = vmul.f32 %v484_v42, %v477_v33 }
  0x9f   : > { %v497_v57 = vrot.slane %v489_v43, 2  ;;  %v501_v58 = vrot.slane %v492_v44, 2  ;;  %v508_v59 = vsel %vm507_vm6, %v498_v47, 0.0  ;;  %v407_v60 = vadd.f32 %v405_v39, %v1613_v49 }
  0xa0   : > { %v459_v61 = vrot.slane %v458_v51, 2  ;;  %v467_v62 = vrot.slane %v466_v53, 2  ;;  %v532_v63 = vunpack.c.l.bf16 %v1650_v48  ;;  %v500_v1 = vrot.slane %v491_v56, 2  ;;  %v593_v56 = vld [vmem:[%s1555_s17 + $0x2c] sm:$0x3] }
  0xa1   : > { %v499_v0 = vsel %vm388_vm3, %v497_v57, %v498_v47  ;;  %v516_v2 = vsel %vm507_vm6, %v501_v58, 0.0  ;;  %v533_v3 = vunpack.c.l.bf16 %v530_v54  ;;  %v534_v12 = vrot.slane %v1547_v6, 7 }
  0xa2   : > { %v460_v4 = vadd.f32 %v459_v61, %v458_v51  ;;  %v468_v10 = vadd.f32 %v467_v62, %v466_v53  ;;  %v509_v11 = vadd.f32 %v508_v59, %v499_v0  ;;  %v502_v13 = vsel %vm388_vm3, %v500_v1, %v501_v58 }
  0xa3   : > { %v1661_v14 = vrot.slane %v1549_v7, 7  ;;  %v537_v49 = vrot.slane %v1551_v8, 7  ;;  %v1665_v15 = vrot.slane %v1553_v9, 7  ;;  %v517_v21 = vadd.f32 %v516_v2, %v502_v13 }
  0xa4   : > { %v461_v16 = vrot.slane %v460_v4, 1  ;;  %v469_v18 = vrot.slane %v468_v10, 1  ;;  %v510_v20 = vrot.slane %v509_v11, 4  ;;  %v546_v24 = vmul.f32 %v534_v12, %v531_v55 }
  0xa5   : > { %v536_v22 = vsel %vm373_vm2, %v534_v12, %v1661_v14  ;;  %v539_v23 = vsel %vm373_vm2, %v537_v49, %v1665_v15  ;;  %v548_v26 = vmul.f32 %v1661_v14, %v533_v3  ;;  %v518_v31 = vrot.slane %v517_v21, 4 }
  0xa6   : > { %v462_v28 = vadd.f32 %v461_v16, %v460_v4  ;;  %v470_v29 = vadd.f32 %v469_v18, %v468_v10  ;;  %v511_v30 = vadd.f32 %v510_v20, %v509_v11  ;;  %v547_v32 = vmul.f32 %v536_v22, %v532_v63 }
  0xa7   : > { %v549_v33 = vmul.f32 %v537_v49, %v531_v55  ;;  %v550_v34 = vmul.f32 %v539_v23, %v532_v63  ;;  %v551_v36 = vmul.f32 %v1665_v15, %v533_v3  ;;  %v408_v37 = vadd.f32 %v406_v25, %v1625_v5  ;;  %v644_v49 = vld [vmem:[%s1555_s17 + $0x2c] sm:$0xe] }
  0xa8   : > { %v471_v38 = vmul.f32 %v462_v28, %v462_v28  ;;  %v512_v39 = vrot.slane %v511_v30, 2  ;;  %v519_v40 = vadd.f32 %v518_v31, %v517_v21  ;;  %v558_v41 = vrot.slane %v546_v24, 6  ;;  %v645_v28 = vld [vmem:[%s1555_s17 + $0x30] sm:$0x3] }
  0xa9   : > { %v559_v42 = vrot.slane %v547_v32, 6  ;;  %v561_v43 = vrot.slane %v548_v26, 6  ;;  %v563_v44 = vrot.slane %v549_v33, 6  ;;  %v472_v47 = vmul.f32 %v470_v29, %v470_v29 }
  0xaa   : > { %v473_v51 = vadd.f32 %v471_v38, %v407_v60  ;;  %v513_v53 = vadd.f32 %v512_v39, %v511_v30  ;;  %v520_v54 = vrot.slane %v519_v40, 2  ;;  %v564_v58 = vrot.slane %v550_v34, 6 }
  0xab   : > { %v560_v57 = vsel %vm415_vm4, %v558_v41, %v559_v42  ;;  %v562_v55 = vsel %vm415_vm4, %v559_v42, %v561_v43  ;;  %v566_v59 = vrot.slane %v551_v36, 6  ;;  %v594_v62 = vunpack.c.h.bf16 %v1650_v48 }
  0xac   : > { %v514_v61 = vrot.slane %v513_v53, 1  ;;  %v521_v5 = vadd.f32 %v520_v54, %v519_v40  ;;  %v572_v25 = vsel %vm440_vm5, %v562_v55, 0.0  ;;  %v565_v63 = vsel %vm415_vm4, %v563_v44, %v564_v58 }
  0xad   : > { %v567_v60 = vsel %vm415_vm4, %v564_v58, %v566_v59  ;;  %v573_v0 = vadd.f32 %v572_v25, %v560_v57  ;;  %v595_v1 = vunpack.c.l.bf16 %v593_v56  ;;  %v596_v10 = vrot.slane %v1547_v6, 5 }
  0xae   : > { %v515_v2 = vadd.f32 %v514_v61, %v513_v53  ;;  %v522_v3 = vrot.slane %v521_v5, 1  ;;  %v580_v4 = vsel %vm440_vm5, %v567_v60, 0.0  ;;  %v1684_v13 = vrot.slane %v1549_v7, 5 }
  0xaf   : > { %v574_v11 = vrot.slane %v573_v0, 4  ;;  %v581_v12 = vadd.f32 %v580_v4, %v565_v63  ;;  %v599_v48 = vrot.slane %v1551_v8, 5  ;;  %v474_v16 = vadd.f32 %v472_v47, %v408_v37 }
  0xb0   : > { %v523_v18 = vadd.f32 %v522_v3, %v521_v5  ;;  %v524_v20 = vmul.f32 %v515_v2, %v515_v2  ;;  %v1689_v21 = vrot.slane %v1553_v9, 5  ;;  %v598_v24 = vsel %vm440_vm5, %v596_v10, %v1684_v13 }
  0xb1   : > { %v575_v22 = vadd.f32 %v574_v11, %v573_v0  ;;  %v582_v23 = vrot.slane %v581_v12, 4  ;;  %v607_v26 = vmul.f32 %v1684_v13, %v595_v1  ;;  %v606_v31 = vmul.f32 %v598_v24, %v594_v62 }
  0xb2   : > { %v525_v29 = vmul.f32 %v523_v18, %v523_v18  ;;  %v601_v30 = vsel %vm440_vm5, %v599_v48, %v1689_v21  ;;  %v646_v32 = vunpack.c.l.bf16 %v644_v49  ;;  %v609_v37 = vmul.f32 %v1689_v21, %v595_v1 }
  0xb3   : > { %v576_v33 = vrot.slane %v575_v22, 2  ;;  %v583_v34 = vadd.f32 %v582_v23, %v581_v12  ;;  %v608_v36 = vmul.f32 %v601_v30, %v594_v62  ;;  %v526_v38 = vadd.f32 %v524_v20, %v473_v51  ;;  %v697_v30 = vld [vmem:[%s1555_s17 + $0x34] sm:$0x3] }
  0xb4   : > { %v614_v39 = vrot.slane %v606_v31, 1  ;;  %v615_v40 = vrot.slane %v607_v26, 1  ;;  %v647_v41 = vunpack.c.l.bf16 %v645_v28  ;;  %v618_v47 = vrot.slane %v609_v37, 1  ;;  %v732_v31 = vld [vmem:[%s1555_s17 + $0x34] sm:$0xc] }
  0xb5   : > { %v577_v42 = vadd.f32 %v576_v33, %v575_v22  ;;  %v584_v43 = vrot.slane %v583_v34, 2  ;;  %v617_v44 = vrot.slane %v608_v36, 1  ;;  %v648_v56 = vrot.slane %v1547_v6, 4  ;;  %v696_v22 = vld [vmem:[%s1555_s17 + $0x30] sm:$0xc] }
  0xb6   : > { %v616_v53 = vsel %vm307_vm0, %v614_v39, %v615_v40  ;;  %v624_v54 = vsel %vm415_vm4, %v615_v40, 0.0  ;;  %v649_v57 = vrot.slane %v1549_v7, 4  ;;  %v632_v61 = vsel %vm415_vm4, %v618_v47, 0.0 }
  0xb7   : > { %v578_v55 = vrot.slane %v577_v42, 1  ;;  %v585_v58 = vadd.f32 %v584_v43, %v583_v34  ;;  %v619_v59 = vsel %vm307_vm0, %v617_v44, %v618_v47  ;;  %v625_v51 = vadd.f32 %v624_v54, %v616_v53 }
  0xb8   : > { %v650_v5 = vsel %vm507_vm6, %v648_v56, %v649_v57  ;;  %v651_v25 = vrot.slane %v1551_v8, 4  ;;  %v652_v62 = vrot.slane %v1553_v9, 4  ;;  %v633_v6 = vadd.f32 %v632_v61, %v619_v59 }
  0xb9   : > { %v579_v63 = vadd.f32 %v578_v55, %v577_v42  ;;  %v586_v60 = vrot.slane %v585_v58, 1  ;;  %v626_v0 = vrot.slane %v625_v51, 4  ;;  %v658_v2 = vmul.f32 %v650_v5, %v646_v32 }
  0xba   : > { %v653_v1 = vsel %vm507_vm6, %v651_v25, %v652_v62  ;;  %v659_v3 = vmul.f32 %v649_v57, %v647_v41  ;;  %v661_v4 = vmul.f32 %v652_v62, %v647_v41  ;;  %v634_v48 = vrot.slane %v633_v6, 4  ;;  %v733_v25 = vld [vmem:[%s1555_s17 + $0x38] sm:$0x3] }
  0xbb   : > { %v587_v10 = vadd.f32 %v586_v60, %v585_v58  ;;  %v588_v11 = vmul.f32 %v579_v63, %v579_v63  ;;  %v627_v12 = vadd.f32 %v626_v0, %v625_v51  ;;  %v660_v49 = vmul.f32 %v653_v1, %v646_v32 }
  0xbc   : > { %v666_v8 = vrot.slane %v658_v2, 3  ;;  %v667_v18 = vrot.slane %v659_v3, 3  ;;  %v670_v20 = vrot.slane %v661_v4, 3  ;;  %v527_v23 = vadd.f32 %v525_v29, %v474_v16 }
  0xbd   : > { %v589_v24 = vmul.f32 %v587_v10, %v587_v10  ;;  %v628_v26 = vrot.slane %v627_v12, 2  ;;  %v635_v28 = vadd.f32 %v634_v48, %v633_v6  ;;  %v669_v34 = vrot.slane %v660_v49, 3 }
  0xbe   : > { %v668_v33 = vsel %vm348_vm1, %v666_v8, %v667_v18  ;;  %v676_v36 = vsel %vm373_vm2, %v667_v18, 0.0  ;;  %v684_v37 = vsel %vm373_vm2, %v670_v20, 0.0  ;;  %v590_v39 = vadd.f32 %v588_v11, %v526_v38 }
  0xbf   : > { %v629_v40 = vadd.f32 %v628_v26, %v627_v12  ;;  %v636_v32 = vrot.slane %v635_v28, 2  ;;  %v677_v41 = vadd.f32 %v676_v36, %v668_v33  ;;  %v671_v42 = vsel %vm348_vm1, %v669_v34, %v670_v20 }
  0xc0   : > { %v698_v16 = vunpack.c.l.bf16 %v696_v22  ;;  %v699_v29 = vunpack.c.l.bf16 %v697_v30  ;;  %v734_v43 = vunpack.c.l.bf16 %v732_v31  ;;  %v685_v54 = vadd.f32 %v684_v37, %v671_v42 }
  0xc1   : > { %v630_v44 = vrot.slane %v629_v40, 1  ;;  %v637_v47 = vadd.f32 %v636_v32, %v635_v28  ;;  %v678_v53 = vrot.slane %v677_v41, 4  ;;  %v591_v12 = vadd.f32 %v589_v24, %v527_v23  ;;  %v770_v24 = vld [vmem:[%s1555_s17 + $0x38] sm:$0xe] }
  0xc2   : > { %v700_v56 = vmul.f32 %v698_v16, %v649_v57  ;;  %v701_v55 = vmul.f32 %v699_v29, %v649_v57  ;;  %v702_v58 = vmul.f32 %v698_v16, %v652_v62  ;;  %v703_v59 = vmul.f32 %v699_v29, %v652_v62 }
  0xc3   : > { %v631_v51 = vadd.f32 %v630_v44, %v629_v40  ;;  %v638_v61 = vrot.slane %v637_v47, 1  ;;  %v679_v38 = vadd.f32 %v678_v53, %v677_v41  ;;  %v686_v5 = vrot.slane %v685_v54, 4 }
  0xc4   : > { %v708_v63 = vrot.slane %v700_v56, 4  ;;  %v709_v60 = vrot.slane %v701_v55, 4  ;;  %v711_v0 = vrot.slane %v702_v58, 4  ;;  %v712_v6 = vrot.slane %v703_v59, 4 }
  0xc5   : > { %v639_v1 = vadd.f32 %v638_v61, %v637_v47  ;;  %v640_v2 = vmul.f32 %v631_v51, %v631_v51  ;;  %v680_v3 = vrot.slane %v679_v38, 2  ;;  %v687_v4 = vadd.f32 %v686_v5, %v685_v54 }
  0xc6   : > { %v710_v10 = vsel %vm507_vm6, %v708_v63, %v709_v60  ;;  %v713_v11 = vsel %vm507_vm6, %v711_v0, %v712_v6  ;;  %v735_v57 = vunpack.c.l.bf16 %v733_v25  ;;  %v736_v62 = vmul.f32 %v734_v43, %v1684_v13 }
  0xc7   : > { %v641_v48 = vmul.f32 %v639_v1, %v639_v1  ;;  %v681_v49 = vadd.f32 %v680_v3, %v679_v38  ;;  %v688_v8 = vrot.slane %v687_v4, 2  ;;  %v716_v18 = vrot.slane %v710_v10, 4 }
  0xc8   : > { %v722_v20 = vrot.slane %v713_v11, 4  ;;  %v737_v22 = vmul.f32 %v735_v57, %v1684_v13  ;;  %v738_v26 = vmul.f32 %v734_v43, %v1689_v21  ;;  %v642_v28 = vadd.f32 %v640_v2, %v590_v39  ;;  %v771_v39 = vld [vmem:[%s1555_s17 + $0x3c] sm:$0x1] }
  0xc9   : > { %v682_v30 = vrot.slane %v681_v49, 1  ;;  %v689_v31 = vadd.f32 %v688_v8, %v687_v4  ;;  %v739_v33 = vmul.f32 %v735_v57, %v1689_v21  ;;  %v717_v34 = vadd.f32 %v716_v18, %v710_v10 }
  0xca   : > { %v723_v36 = vadd.f32 %v722_v20, %v713_v11  ;;  %v744_v37 = vrot.slane %v736_v62, 4  ;;  %v745_v23 = vrot.slane %v737_v22, 4  ;;  %v747_v41 = vrot.slane %v738_v26, 4  ;;  %v808_v11 = vld [vmem:[%s1555_s17 + $0x3c] sm:$0x7] }
  0xcb   : > { %v683_v40 = vadd.f32 %v682_v30, %v681_v49  ;;  %v690_v32 = vrot.slane %v689_v31, 1  ;;  %v748_v42 = vrot.slane %v739_v33, 4  ;;  %v643_v16 = vadd.f32 %v641_v48, %v591_v12  ;;  %v836_v49 = vld [vmem:[%s1555_s17 + $0x3c] sm:$0x8] }
  0xcc   : > { %v718_v29 = vrot.slane %v717_v34, 2  ;;  %v724_v13 = vrot.slane %v723_v36, 2  ;;  %v746_v43 = vsel %vm507_vm6, %v744_v37, %v745_v23  ;;  %v772_v53 = vunpack.c.l.bf16 %v770_v24 }
  0xcd   : > { %v691_v44 = vadd.f32 %v690_v32, %v689_v31  ;;  %v749_v47 = vsel %vm507_vm6, %v747_v41, %v748_v42  ;;  %v752_v21 = vsel %vm307_vm0, %v746_v43, 0.0  ;;  %v692_v59 = vmul.f32 %v683_v40, %v683_v40 }
  0xce   : > { %v719_v54 = vadd.f32 %v718_v29, %v717_v34  ;;  %v725_v56 = vadd.f32 %v724_v13, %v723_v36  ;;  %v753_v55 = vrot.slane %v752_v21, 4  ;;  %v759_v58 = vsel %vm307_vm0, %v749_v47, 0.0  ;;  %v837_v36 = vld [vmem:[%s1555_s17 + $0x40] sm:$0x1] }
  0xcf   : > { %v693_v51 = vmul.f32 %v691_v44, %v691_v44  ;;  %v760_v61 = vrot.slane %v759_v58, 4  ;;  %v773_v38 = vunpack.c.l.bf16 %v771_v39  ;;  %v774_v60 = vmul.f32 %v772_v53, %v1661_v14 }
  0xd0   : > { %v720_v5 = vrot.slane %v719_v54, 1  ;;  %v726_v25 = vrot.slane %v725_v56, 1  ;;  %v754_v63 = vadd.f32 %v753_v55, %v752_v21  ;;  %v776_v1 = vmul.f32 %v772_v53, %v1665_v15 }
  0xd1   : > { %v761_v0 = vadd.f32 %v760_v61, %v759_v58  ;;  %v775_v6 = vmul.f32 %v773_v38, %v1661_v14  ;;  %v777_v10 = vmul.f32 %v773_v38, %v1665_v15  ;;  %v782_v62 = vrot.slane %v774_v60, 3  ;;  %v874_v61 = vld [vmem:[%s1555_s17 + $0x40] sm:$0x6] }
  0xd2   : > { %v721_v2 = vadd.f32 %v720_v5, %v719_v54  ;;  %v727_v3 = vadd.f32 %v726_v25, %v725_v56  ;;  %v755_v4 = vrot.slane %v754_v63, 2  ;;  %v785_v48 = vrot.slane %v776_v1, 3 }
  0xd3   : > { %v762_v57 = vrot.slane %v761_v0, 2  ;;  %v783_v12 = vrot.slane %v775_v6, 3  ;;  %v694_v8 = vadd.f32 %v692_v59, %v642_v28  ;;  %v695_v18 = vadd.f32 %v693_v51, %v643_v16 }
  0xd4   : > { %v756_v20 = vadd.f32 %v755_v4, %v754_v63  ;;  %v786_v22 = vrot.slane %v777_v10, 3  ;;  %v728_v26 = vmul.f32 %v721_v2, %v721_v2  ;;  %v809_v31 = vunpack.c.l.bf16 %v808_v11 }
  0xd5   : > { %v763_v14 = vadd.f32 %v762_v57, %v761_v0  ;;  %v784_v30 = vsel %vm348_vm1, %v782_v62, %v783_v12  ;;  %v729_v33 = vmul.f32 %v727_v3, %v727_v3  ;;  %v838_v37 = vunpack.c.l.bf16 %v836_v49 }
  0xd6   : > { %v757_v34 = vrot.slane %v756_v20, 1  ;;  %v787_v15 = vsel %vm348_vm1, %v785_v48, %v786_v22  ;;  %v790_v24 = vsel %vm388_vm3, %v784_v30, 0.0  ;;  %v810_v28 = vmul.f32 %v809_v31, %v1636_v27 }
  0xd7   : > { %v764_v23 = vrot.slane %v763_v14, 1  ;;  %v797_v40 = vsel %vm388_vm3, %v787_v15, 0.0  ;;  %v791_v41 = vrot.slane %v790_v24, 4  ;;  %v811_v16 = vmul.f32 %v809_v31, %v1642_v35 }
  0xd8   : > { %v758_v32 = vadd.f32 %v757_v34, %v756_v20  ;;  %v798_v42 = vrot.slane %v797_v40, 4  ;;  %v814_v13 = vrot.slane %v810_v28, 1  ;;  %v839_v43 = vunpack.c.l.bf16 %v837_v36 }
  0xd9   : > { %v765_v29 = vadd.f32 %v764_v23, %v763_v14  ;;  %v840_v39 = vmul.f32 %v838_v37, %v1610_v46  ;;  %v730_v44 = vadd.f32 %v728_v26, %v694_v8  ;;  %v792_v47 = vadd.f32 %v791_v41, %v790_v24  ;;  %v902_v23 = vld [vmem:[%s1555_s17 + $0x40] sm:$0xc] }
  0xda   : > { %v799_v21 = vadd.f32 %v798_v42, %v797_v40  ;;  %v815_v53 = vrot.slane %v811_v16, 1  ;;  %v731_v54 = vadd.f32 %v729_v33, %v695_v18  ;;  %v818_v56 = vsel %vm348_vm1, %v814_v13, 0.0 }
  0xdb   : > { %v841_v27 = vmul.f32 %v839_v43, %v1610_v46  ;;  %v842_v55 = vmul.f32 %v838_v37, %v1616_v50  ;;  %v766_v58 = vmul.f32 %v758_v32, %v758_v32  ;;  %v793_v59 = vrot.slane %v792_v47, 2 }
  0xdc   : > { %v800_v35 = vrot.slane %v799_v21, 2  ;;  %v819_v51 = vrot.slane %v818_v56, 4  ;;  %v767_v38 = vmul.f32 %v765_v29, %v765_v29  ;;  %v825_v5 = vsel %vm348_vm1, %v815_v53, 0.0 }
  0xdd   : > { %v843_v25 = vmul.f32 %v839_v43, %v1616_v50  ;;  %v848_v63 = vrot.slane %v840_v39, 6  ;;  %v794_v60 = vadd.f32 %v793_v59, %v792_v47  ;;  %v826_v1 = vrot.slane %v825_v5, 4 }
  0xde   : > { %v801_v0 = vadd.f32 %v800_v35, %v799_v21  ;;  %v820_v6 = vadd.f32 %v819_v51, %v818_v56  ;;  %v849_v2 = vrot.slane %v841_v27, 6  ;;  %v851_v3 = vrot.slane %v842_v55, 6 }
  0xdf   : > { %v852_v46 = vrot.slane %v843_v25, 6  ;;  %v875_v4 = vunpack.c.l.bf16 %v874_v61  ;;  %v795_v10 = vrot.slane %v794_v60, 1  ;;  %v827_v62 = vadd.f32 %v826_v1, %v825_v5 }
  0xe0   : > { %v802_v11 = vrot.slane %v801_v0, 1  ;;  %v821_v57 = vrot.slane %v820_v6, 2  ;;  %v850_v12 = vsel %vm415_vm4, %v848_v63, %v849_v2  ;;  %v768_v33 = vadd.f32 %v766_v58, %v730_v44 }
  0xe1   : > { %v853_v48 = vsel %vm415_vm4, %v851_v3, %v852_v46  ;;  %v876_v49 = vmul.f32 %v875_v4, %v1587_v45  ;;  %v877_v50 = vmul.f32 %v875_v4, %v1593_v52  ;;  %v796_v8 = vadd.f32 %v795_v10, %v794_v60 }
  0xe2   : > { %v803_v18 = vadd.f32 %v802_v11, %v801_v0  ;;  %v822_v20 = vadd.f32 %v821_v57, %v820_v6  ;;  %v828_v22 = vrot.slane %v827_v62, 2  ;;  %v856_v26 = vsel %vm507_vm6, %v850_v12, 0.0 }
  0xe3   : > { %v863_v14 = vsel %vm507_vm6, %v853_v48, 0.0  ;;  %v880_v30 = vrot.slane %v876_v49, 2  ;;  %v881_v31 = vrot.slane %v877_v50, 2  ;;  %v857_v36 = vrot.slane %v856_v26, 4  ;;  %v930_v48 = vld [vmem:[%s1555_s17 + $0x40] sm:$0x8] }
  0xe4   : > { %v823_v34 = vrot.slane %v822_v20, 1  ;;  %v829_v15 = vadd.f32 %v828_v22, %v827_v62  ;;  %v864_v37 = vrot.slane %v863_v14, 4  ;;  %v769_v24 = vadd.f32 %v767_v38, %v731_v54 }
  0xe5   : > { %v884_v45 = vsel %vm440_vm5, %v880_v30, 0.0  ;;  %v891_v52 = vsel %vm440_vm5, %v881_v31, 0.0  ;;  %v804_v40 = vmul.f32 %v796_v8, %v796_v8  ;;  %v805_v28 = vmul.f32 %v803_v18, %v803_v18 }
  0xe6   : > { %v830_v32 = vrot.slane %v829_v15, 1  ;;  %v858_v41 = vadd.f32 %v857_v36, %v856_v26  ;;  %v865_v42 = vadd.f32 %v864_v37, %v863_v14  ;;  %v885_v16 = vrot.slane %v884_v45, 4 }
  0xe7   : > { %v892_v29 = vrot.slane %v891_v52, 4  ;;  %v824_v13 = vadd.f32 %v823_v34, %v822_v20  ;;  %v903_v39 = vunpack.c.l.bf16 %v902_v23  ;;  %v806_v56 = vadd.f32 %v804_v40, %v768_v33 }
  0xe8   : > { %v831_v43 = vadd.f32 %v830_v32, %v829_v15  ;;  %v859_v44 = vrot.slane %v858_v41, 2  ;;  %v866_v47 = vrot.slane %v865_v42, 2  ;;  %v886_v21 = vadd.f32 %v885_v16, %v884_v45 }
  0xe9   : > { %v893_v53 = vadd.f32 %v892_v29, %v891_v52  ;;  %v807_v27 = vadd.f32 %v805_v28, %v769_v24  ;;  %v904_v55 = vmul.f32 %v903_v39, %v1561_v17  ;;  %v905_v54 = vmul.f32 %v903_v39, %v1565_v19 }
  0xea   : > { %v860_v58 = vadd.f32 %v859_v44, %v858_v41  ;;  %v867_v59 = vadd.f32 %v866_v47, %v865_v42  ;;  %v887_v35 = vrot.slane %v886_v21, 2  ;;  %v832_v61 = vmul.f32 %v824_v13, %v824_v13 }
  0xeb   : > { %v894_v51 = vrot.slane %v893_v53, 2  ;;  %v833_v38 = vmul.f32 %v831_v43, %v831_v43  ;;  %v908_v5 = vrot.slane %v904_v55, 5  ;;  %v909_v25 = vrot.slane %v905_v54, 5 }
  0xec   : > { %v861_v63 = vrot.slane %v860_v58, 1  ;;  %v868_v60 = vrot.slane %v867_v59, 1  ;;  %v888_v0 = vadd.f32 %v887_v35, %v886_v21  ;;  %v834_v11 = vadd.f32 %v832_v61, %v806_v56 }
  0xed   : > { %v895_v6 = vadd.f32 %v894_v51, %v893_v53  ;;  %v912_v1 = vsel %vm415_vm4, %v908_v5, 0.0  ;;  %v919_v2 = vsel %vm415_vm4, %v909_v25, 0.0  ;;  %v835_v57 = vadd.f32 %v833_v38, %v807_v27 }
  0xee   : > { %v862_v17 = vadd.f32 %v861_v63, %v860_v58  ;;  %v869_v3 = vadd.f32 %v868_v60, %v867_v59  ;;  %v889_v19 = vrot.slane %v888_v0, 1  ;;  %v913_v4 = vrot.slane %v912_v1, 4 }
  0xef   : > { %v896_v46 = vrot.slane %v895_v6, 1  ;;  %v920_v10 = vrot.slane %v919_v2, 4  ;;  %v931_v26 = vunpack.c.l.bf16 %v930_v48 }
  0xf0   : > { %v870_v62 = vmul.f32 %v862_v17, %v862_v17  ;;  %v871_v12 = vmul.f32 %v869_v3, %v869_v3  ;;  %v890_v49 = vadd.f32 %v889_v19, %v888_v0  ;;  %v914_v8 = vadd.f32 %v913_v4, %v912_v1 }
  0xf1   : > { %v897_v50 = vadd.f32 %v896_v46, %v895_v6  ;;  %v921_v18 = vadd.f32 %v920_v10, %v919_v2  ;;  %v932_v45 = vmul.f32 %v931_v26, %v1549_v7  ;;  %v933_v52 = vmul.f32 %v931_v26, %v1553_v9 }
  0xf2   : > { %v915_v20 = vrot.slane %v914_v8, 2  ;;  %v872_v14 = vadd.f32 %v870_v62, %v834_v11  ;;  %v873_v30 = vadd.f32 %v871_v12, %v835_v57  ;;  %v898_v31 = vmul.f32 %v890_v49, %v890_v49 }
  0xf3   : > { %v922_v22 = vrot.slane %v921_v18, 2  ;;  %v899_v33 = vmul.f32 %v897_v50, %v897_v50  ;;  %v936_v42 = vmul.f32 %v932_v45, %v932_v45  ;;  %v937_v16 = vmul.f32 %v933_v52, %v933_v52 }
  0xf4   : > { %v916_v34 = vadd.f32 %v915_v20, %v914_v8  ;;  %v900_v23 = vadd.f32 %v898_v31, %v872_v14 }
  0xf5   : > { %v923_v15 = vadd.f32 %v922_v22, %v921_v18  ;;  %v901_v24 = vadd.f32 %v899_v33, %v873_v30 }
  0xf6   : > { %v917_v36 = vrot.slane %v916_v34, 1 }
  0xf7   : > { %v924_v37 = vrot.slane %v923_v15, 1 }
  0xf8   : > { %v918_v40 = vadd.f32 %v917_v36, %v916_v34 }
  0xf9   : > { %v925_v28 = vadd.f32 %v924_v37, %v923_v15 }
  0xfa   : > { %v926_v32 = vmul.f32 %v918_v40, %v918_v40 }
  0xfb   : > { %v927_v41 = vmul.f32 %v925_v28, %v925_v28 }
  0xfc   : > { %v928_v29 = vadd.f32 %v926_v32, %v900_v23 }
  0xfd   : > { %v929_v13 = vadd.f32 %v927_v41, %v901_v24 }
  0xfe   : > { %v938_v43 = vadd.f32 %v936_v42, %v928_v29 }
  0xff   : > { %v939_v7 = vadd.f32 %v937_v16, %v929_v13 }
 0x100   : > { %945 = vst [vmem:[%s262_s9 - $0x7] sm:$0x80] %v938_v43 }
 0x101   : > { %v942_v39 = vrot.slane %v939_v7, 7 }
 0x103   : > { %946 = vst [vmem:[%s262_s9 + $0x1] sm:$0x1] %v942_v39 }
 0x104   : > { %1259 = shalt.err (!%p1256_p9)
}
 0x105   : > { %s1260_s1 = scalar_lea.hbm %s959_s29, 32  ;;  %s1264_s27 = scalar_lea.hbm %s1803_s3, 64 }
 0x106   : > { %p1261_p12 = scmp.ne.s32.totalorder %s959_s29, %s1260_s1  ;;  %p1265_p1 = scmp.lt.s32.totalorder %s959_s29, %s1803_s3 }
 0x107   : > { %p1266_p3 = scmp.lt.s32.totalorder %s1264_s27, %s1260_s1 }
 0x108   : > { %p1262_p0 = pnand %p1261_p12, %p1827_p7 }
 0x109   : > { %p1267_p5 = por %p1266_p3, %p1265_p1 }
 0x10a   : > { %p1263_p11 = pneg %p1262_p0 }
 0x10c   : > { %p1268_p13 = pnand %p1267_p5, %p1263_p11 }
 0x10e   : > { %1271 = shalt.err (!%p1268_p13)
}
 0x10f   : > { %1107 = dma.vmem_to_hbm [thread:$0]  (%p1827_p7), %s962_s5, 32, %s959_s29, %s948_s28  }
 0x110 PF: > { %s973_s26 = sand.u32 1, %s1302_s12   ;;  %p1828_p8 = scmp.ne.s32.totalorder %s1814_s24, 0 }
 0x111   : > { %p1829_p10 = scmp.ge.s32.totalorder %s1314_s15, 2  ;;  %s974_s11 = scalar_lea.sflag [#allocation4], %s973_s26 }
 0x113   : > { %p1120_p2 = pnand %p1829_p10, %p1828_p8 }
 0x115   : > { %p1121_p4 = pneg %p1120_p2 }
 0x117   : > { %1297 = dma.done.wait (%p1121_p4), %s974_s11, 32  }
 0x118   : > { %1299 = vsyncadd (%p1121_p4), %s974_s11, 4294967264  ;;  %p19_p6 = scmp.ge.s32.totalorder %s1370_s18, 4   ;;  %s1830_s12 = smov %s1306_s13 }
 0x119   : > { %s1831_s13 = smov %s1310_s14  ;;  %s1832_s14 = smov %s1382_s21 }
 0x11a   : > { %s1833_s15 = smov %s1370_s18  ;;  %21 = sbr.rel (!%p19_p6) target bundleno = 10 (0xa), region = 101 }
 0x11f   :  { %979 = vsyncpa [#allocation3], 1 }
 0x120   :  { %981 = vsyncpa [#allocation3 + $0x1], 1 }
 0x121   :  { %982 = vsyncpa [#allocation6], 1 }
 0x122   :  { %984 = vsyncpa [#allocation6 + $0x1], 1 }
 0x123   :  { %985 = vsyncpa [#allocation4], 1 }
 0x124   :  { %987 = vsyncpa [#allocation4 + $0x1], 1 }

</bundles_post_ra>
